<compile_context>
chip_gen: v5e
topology: v5e:2x2
jax: 0.10.0
libtpu: 0.0.40
codegen_flags: <defaults>
</compile_context>

<pallas_src>
import functools
import math

import jax
import jax.numpy as jnp
from jax import lax
from jax.experimental import pallas as pl
from jax.experimental.pallas import tpu as pltpu

# ---- small, module-consistent shapes -------------------------------------
VOCAB = 64
SEQ = 8          # tokens per sentence
IN_DIM = 32      # embedding dim
MEM_DIM = 32     # LSTM memory dim (rep_dim)
HIDDEN0 = 32     # hidden_dims[0]
HIDDEN1 = 8      # hidden_dims[1]  (final output dim)
LANE = 128       # lane width used to keep the output store dense


# ---- fused kernel: gather+proj (folded) + PLSTM (both sides) + DualMLP ----
def sent_pair_kernel(ids_ref, wfold_ref, bfold_ref, wh_ref, zc_ref,
                     w1_ref, b1_ref, w2_ref, b2_ref, out_ref,
                     *, mem_dim, seq_len, vocab, tile_b):
    f32 = jnp.float32
    rows_per_step = 2 * tile_b                 # [left_0..left_{tb-1}, right_0..right_{tb-1}]
    n_rows = seq_len * rows_per_step

    # ---- in-kernel embedding gather fused with the input projection --------
    # xproj = onehot @ (emb @ wx) + (bx + bh)   -- exact fold, one MXU matmul.
    ids = ids_ref[0]                                               # (n_rows, 1) int32
    iota = lax.broadcasted_iota(jnp.int32, (n_rows, vocab), 1)
    onehot = jnp.where(ids == iota, 1.0, 0.0).astype(f32)          # (n_rows, vocab)
    xproj = (jnp.dot(onehot, wfold_ref[...], preferred_element_type=f32)
             + bfold_ref[...])                                     # (n_rows, 4*mem)

    wh = wh_ref[...]
    # Hoist the zc broadcast out of the unrolled recurrence (no CSE otherwise).
    zc_b = jnp.broadcast_to(zc_ref[...], (rows_per_step, mem_dim))

    # ---- fused PLSTM recurrence: carry rows = lefts then rights ------------
    c = jnp.zeros((rows_per_step, mem_dim), f32)
    h = jnp.zeros((rows_per_step, mem_dim), f32)
    for t in range(seq_len):                                       # static full unroll (SEQ=8)
        g_x = xproj[t * rows_per_step:(t + 1) * rows_per_step, :]  # static slice
        iofu = g_x + jnp.dot(h, wh, preferred_element_type=f32)    # biases already folded
        sig = jax.nn.sigmoid(iofu)                                 # one EUP push for i,o,f
        i = sig[:, 0 * mem_dim:1 * mem_dim]
        o = sig[:, 1 * mem_dim:2 * mem_dim]
        f = sig[:, 2 * mem_dim:3 * mem_dim]
        # PLSTM peephole candidate: u = tanh(u_raw + zc * c_{t-1})
        u = jnp.tanh(iofu[:, 3 * mem_dim:4 * mem_dim] + zc_b * c)
        c = i * u + f * c
        h = o * jnp.tanh(c)                                        # use_o=True

    # ---- DualMLP ------------------------------------------------------------
    lrep = h[0:tile_b, :]
    rrep = h[tile_b:2 * tile_b, :]
    mult_dist = lrep * rrep
    abs_dist = jnp.abs(lrep - rrep)
    vec_dist = jnp.concatenate([mult_dist, abs_dist], axis=1)      # (tb, 2*mem)
    hid = jnp.dot(vec_dist, w1_ref[...], preferred_element_type=f32) + b1_ref[...]
    hid = jnp.maximum(hid, 0.0)                                    # ReLU
    out = jnp.dot(hid, w2_ref[...], preferred_element_type=f32) + b2_ref[...]  # (tb, 128) lane-dense
    out_ref[0] = out


def _round_up(x, m):
    return -(-x // m) * m


# ---- wrapper --------------------------------------------------------------
def sent_pair_forward(l_ids, r_ids, params, *, tile_b=128):
    """l_ids, r_ids: (B, SEQ) int32 token ids. Returns (B, HIDDEN1) f32."""
    B, seq = l_ids.shape

    # Tile choice: aim for >= 2 grid tiles (both v7x TensorCores busy) and
    # >= 8 rows per tile (sublane-aligned carries); pad the batch instead of
    # shrinking tiles below 8.
    tile_b = max(8, min(tile_b, _round_up(pl.cdiv(B, 2), 8)))
    n_tiles = max(2, pl.cdiv(B, tile_b))
    Bp = n_tiles * tile_b
    pad = Bp - B
    if pad:
        l_ids = jnp.concatenate([l_ids, jnp.zeros((pad, seq), l_ids.dtype)], axis=0)
        r_ids = jnp.concatenate([r_ids, jnp.zeros((pad, seq), r_ids.dtype)], axis=0)

    # Token-id layout per batch tile: row index = t*(2*tile_b) + side*tile_b + p
    #   (side 0 = left sentence, 1 = right sentence)
    lpad = l_ids.reshape(n_tiles, tile_b, seq)
    rpad = r_ids.reshape(n_tiles, tile_b, seq)
    stacked = jnp.stack([lpad, rpad], axis=2)                  # (g, p, side, t)
    ids = jnp.transpose(stacked, (0, 3, 2, 1))                 # (g, t, side, p)
    ids = ids.reshape(n_tiles, seq * 2 * tile_b)[..., None].astype(jnp.int32)

    # Fold embedding + input projection + both biases (exact in f32).
    w_fold = jnp.dot(params["emb"], params["wx"])              # (VOCAB, 4*MEM)
    b_fold = params["bx"] + params["bh"]                       # (1, 4*MEM)

    # Pad layer_2 to 128 output lanes -> unmasked, lane-dense output store.
    w2p = jnp.zeros((HIDDEN0, LANE), jnp.float32).at[:, :HIDDEN1].set(params["w2"])
    b2p = jnp.zeros((1, LANE), jnp.float32).at[:, :HIDDEN1].set(params["b2"])

    weights = (w_fold, b_fold, params["wh"], params["zc"],
               params["w1"], params["b1"], w2p, b2p)

    def wspec(a):
        nd = a.ndim
        return pl.BlockSpec(a.shape, lambda g, _nd=nd: (0,) * _nd)

    kernel = functools.partial(sent_pair_kernel, mem_dim=MEM_DIM,
                               seq_len=seq, vocab=VOCAB, tile_b=tile_b)

    # Advisory cost estimate (per the review: kernel is compute/latency bound).
    n_rows = seq * 2 * tile_b
    flops_per_tile = (
        2 * n_rows * VOCAB * 4 * MEM_DIM                         # folded gather+proj matmul
        + seq * 2 * (2 * tile_b) * MEM_DIM * 4 * MEM_DIM         # recurrence matmuls
        + seq * 10 * (2 * tile_b) * MEM_DIM                      # gate elementwise (approx)
        + 2 * tile_b * (2 * MEM_DIM) * HIDDEN0                   # layer_1
        + 2 * tile_b * HIDDEN0 * LANE                            # layer_2 (padded)
    )
    transc_per_tile = seq * ((2 * tile_b) * 4 * MEM_DIM + 2 * (2 * tile_b) * MEM_DIM)
    weight_bytes = sum(int(w.size) * 4 for w in weights)
    bytes_per_tile = n_rows * 4 + tile_b * LANE * 4
    cost = pl.CostEstimate(flops=n_tiles * flops_per_tile,
                           transcendentals=n_tiles * transc_per_tile,
                           bytes_accessed=n_tiles * bytes_per_tile + weight_bytes)

    out = pl.pallas_call(
        kernel,
        out_shape=jax.ShapeDtypeStruct((n_tiles, tile_b, LANE), jnp.float32),
        grid=(n_tiles,),
        in_specs=[pl.BlockSpec((1, seq * 2 * tile_b, 1), lambda g: (g, 0, 0))]
                 + [wspec(a) for a in weights],
        out_specs=pl.BlockSpec((1, tile_b, LANE), lambda g: (g, 0, 0)),
        compiler_params=pltpu.CompilerParams(
            dimension_semantics=("parallel",)),
        cost_estimate=cost,
    )(ids, *weights)

    return out.reshape(Bp, LANE)[:B, :HIDDEN1]


# ---- deterministic parameter init (synthetic, PyTorch-like uniform) -------
def init_params(key):
    ks = jax.random.split(key, 12)

    def unif(k, shape, bound):
        return jax.random.uniform(k, shape, jnp.float32, -bound, bound)

    params = {
        "emb": jax.random.normal(ks[0], (VOCAB, IN_DIM), jnp.float32),
        # PLSTM: iofux (in_dim -> 4*mem), iofuh (mem -> 4*mem), zc (1, mem)
        "wx": unif(ks[1], (IN_DIM, 4 * MEM_DIM), 1.0 / math.sqrt(IN_DIM)),
        "bx": unif(ks[2], (1, 4 * MEM_DIM), 1.0 / math.sqrt(IN_DIM)),
        "wh": unif(ks[3], (MEM_DIM, 4 * MEM_DIM), 1.0 / math.sqrt(MEM_DIM)),
        "bh": unif(ks[4], (1, 4 * MEM_DIM), 1.0 / math.sqrt(MEM_DIM)),
        "zc": unif(ks[5], (1, MEM_DIM), 1.0 / math.sqrt(MEM_DIM)),
        # DualMLP: layer_1 (2*mem -> hidden0), layer_2 (hidden0 -> hidden1)
        "w1": unif(ks[6], (2 * MEM_DIM, HIDDEN0), 1.0 / math.sqrt(2 * MEM_DIM)),
        "b1": unif(ks[7], (1, HIDDEN0), 1.0 / math.sqrt(2 * MEM_DIM)),
        "w2": unif(ks[8], (HIDDEN0, HIDDEN1), 1.0 / math.sqrt(HIDDEN0)),
        "b2": unif(ks[9], (1, HIDDEN1), 1.0 / math.sqrt(HIDDEN0)),
    }
    return params


# ---- pure-JAX reference (single pair) for verification ---------------------
def reference_forward(l_ids, r_ids, p):
    def plstm(emb):
        c = jnp.zeros((1, MEM_DIM), jnp.float32)
        h = jnp.zeros((1, MEM_DIM), jnp.float32)
        for t in range(emb.shape[0]):
            x = emb[t:t + 1]
            iofu = x @ p["wx"] + p["bx"] + h @ p["wh"] + p["bh"]
            i = jax.nn.sigmoid(iofu[:, 0 * MEM_DIM:1 * MEM_DIM])
            o = jax.nn.sigmoid(iofu[:, 1 * MEM_DIM:2 * MEM_DIM])
            f = jax.nn.sigmoid(iofu[:, 2 * MEM_DIM:3 * MEM_DIM])
            u = jnp.tanh(iofu[:, 3 * MEM_DIM:4 * MEM_DIM] + p["zc"] * c)
            c = i * u + f * c
            h = o * jnp.tanh(c)
        return h

    l_emb = p["emb"][l_ids]
    r_emb = p["emb"][r_ids]
    lrep = plstm(l_emb)
    rrep = plstm(r_emb)
    vec = jnp.concatenate([lrep * rrep, jnp.abs(lrep - rrep)], axis=1)
    hid = jnp.maximum(vec @ p["w1"] + p["b1"], 0.0)
    return hid @ p["w2"] + p["b2"]


if __name__ == "__main__":
    key = jax.random.PRNGKey(0)
    pkey, lkey, rkey = jax.random.split(key, 3)
    params = init_params(pkey)

    B = 2
    l_ids = jax.random.randint(lkey, (B, SEQ), 0, VOCAB, dtype=jnp.int32)
    r_ids = jax.random.randint(rkey, (B, SEQ), 0, VOCAB, dtype=jnp.int32)

    fwd = jax.jit(sent_pair_forward)
    out = jax.block_until_ready(fwd(l_ids, r_ids, params))
    assert out.shape == (B, HIDDEN1)

    for b in range(B):
        ref = jax.block_until_ready(reference_forward(l_ids[b], r_ids[b], params))
        assert jnp.allclose(out[b:b + 1], ref, rtol=1e-4, atol=1e-4), (b, out[b], ref)

    print("KERNEL_OK")
</pallas_src>

<mosaic_0001>
module attributes {stable_mosaic.version = 11 : i64} {
  func.func @sent_pair_kernel(%arg0: i32, %arg1: memref<1x128x1xi32, #tpu.memory_space<vmem>>, %arg2: memref<64x128xf32, #tpu.memory_space<vmem>>, %arg3: memref<1x128xf32, #tpu.memory_space<vmem>>, %arg4: memref<32x128xf32, #tpu.memory_space<vmem>>, %arg5: memref<1x32xf32, #tpu.memory_space<vmem>>, %arg6: memref<64x32xf32, #tpu.memory_space<vmem>>, %arg7: memref<1x32xf32, #tpu.memory_space<vmem>>, %arg8: memref<32x128xf32, #tpu.memory_space<vmem>>, %arg9: memref<1x128xf32, #tpu.memory_space<vmem>>, %arg10: memref<1x8x128xf32, #tpu.memory_space<vmem>>) attributes {dimension_semantics = [#tpu.dimension_semantics<parallel>], iteration_bounds = array<i64: 2>, scalar_prefetch = 0 : i64, scratch_operands = 0 : i64, tpu.core_type = #tpu.core_type<tc>, window_params = [{transform_indices = @transform_0, window_bounds = array<i64: 1, 128, 1>}, {pipeline_mode = #tpu.pipeline_mode<synchronous>, transform_indices = @transform_1, window_bounds = array<i64: 64, 128>}, {pipeline_mode = #tpu.pipeline_mode<synchronous>, transform_indices = @transform_2, window_bounds = array<i64: 1, 128>}, {pipeline_mode = #tpu.pipeline_mode<synchronous>, transform_indices = @transform_3, window_bounds = array<i64: 32, 128>}, {pipeline_mode = #tpu.pipeline_mode<synchronous>, transform_indices = @transform_4, window_bounds = array<i64: 1, 32>}, {pipeline_mode = #tpu.pipeline_mode<synchronous>, transform_indices = @transform_5, window_bounds = array<i64: 64, 32>}, {pipeline_mode = #tpu.pipeline_mode<synchronous>, transform_indices = @transform_6, window_bounds = array<i64: 1, 32>}, {pipeline_mode = #tpu.pipeline_mode<synchronous>, transform_indices = @transform_7, window_bounds = array<i64: 32, 128>}, {pipeline_mode = #tpu.pipeline_mode<synchronous>, transform_indices = @transform_8, window_bounds = array<i64: 1, 128>}, {transform_indices = @transform_9, window_bounds = array<i64: 1, 8, 128>}]} {
    %c0 = arith.constant 0 : index
    %c0_0 = arith.constant 0 : index
    %c0_1 = arith.constant 0 : index
    %0 = vector.load %arg1[%c0, %c0_0, %c0_1] : memref<1x128x1xi32, #tpu.memory_space<vmem>>, vector<1x128x1xi32>
    %1 = vector.shape_cast %0 : vector<1x128x1xi32> to vector<128x1xi32>
    %2 = tpu.iota {dimensions = array<i32: 1>} : vector<128x64xi32>
    %3 = vector.broadcast %1 : vector<128x1xi32> to vector<128x64xi32>
    %4 = arith.cmpi eq, %3, %2 : vector<128x64xi32>
    %cst = arith.constant 1.000000e+00 : f32
    %cst_2 = arith.constant 0.000000e+00 : f32
    %5 = vector.broadcast %cst : f32 to vector<128x64xf32>
    %6 = vector.broadcast %cst_2 : f32 to vector<128x64xf32>
    %7 = arith.select %4, %5, %6 : vector<128x64xi1>, vector<128x64xf32>
    %c0_3 = arith.constant 0 : index
    %c0_4 = arith.constant 0 : index
    %8 = vector.load %arg2[%c0_3, %c0_4] : memref<64x128xf32, #tpu.memory_space<vmem>>, vector<64x128xf32>
    %cst_5 = arith.constant dense<0.000000e+00> : vector<128x128xf32>
    %9 = tpu.matmul %7, %8, %cst_5 {dimension_numbers = #tpu.dot_dimension_numbers<[1], [0], [0], [1], [0, 0, 1, 1], [], []>} : vector<128x64xf32>, vector<64x128xf32>, vector<128x128xf32> -> vector<128x128xf32>
    %c0_6 = arith.constant 0 : index
    %c0_7 = arith.constant 0 : index
    %10 = vector.load %arg3[%c0_6, %c0_7] : memref<1x128xf32, #tpu.memory_space<vmem>>, vector<1x128xf32>
    %11 = vector.broadcast %10 : vector<1x128xf32> to vector<128x128xf32>
    %12 = arith.addf %9, %11 : vector<128x128xf32>
    %c0_8 = arith.constant 0 : index
    %c0_9 = arith.constant 0 : index
    %13 = vector.load %arg4[%c0_8, %c0_9] : memref<32x128xf32, #tpu.memory_space<vmem>>, vector<32x128xf32>
    %c0_10 = arith.constant 0 : index
    %c0_11 = arith.constant 0 : index
    %14 = vector.load %arg5[%c0_10, %c0_11] : memref<1x32xf32, #tpu.memory_space<vmem>>, vector<1x32xf32>
    %15 = vector.shape_cast %14 : vector<1x32xf32> to vector<1x32xf32>
    %16 = vector.broadcast %15 : vector<1x32xf32> to vector<16x32xf32>
    %cst_12 = arith.constant 0.000000e+00 : f32
    %17 = vector.broadcast %cst_12 : f32 to vector<16x32xf32>
    %cst_13 = arith.constant 0.000000e+00 : f32
    %18 = vector.broadcast %cst_13 : f32 to vector<16x32xf32>
    %19 = vector.extract_strided_slice %12 {offsets = [0, 0], sizes = [16, 128], strides = [1, 1]} : vector<128x128xf32> to vector<16x128xf32>
    %cst_14 = arith.constant dense<0.000000e+00> : vector<16x128xf32>
    %20 = tpu.matmul %18, %13, %cst_14 {dimension_numbers = #tpu.dot_dimension_numbers<[1], [0], [0], [1], [0, 0, 1, 1], [], []>} : vector<16x32xf32>, vector<32x128xf32>, vector<16x128xf32> -> vector<16x128xf32>
    %21 = arith.addf %19, %20 : vector<16x128xf32>
    %22 = arith.negf %21 : vector<16x128xf32>
    %23 = math.exp %22 : vector<16x128xf32>
    %cst_15 = arith.constant 1.000000e+00 : f32
    %24 = vector.broadcast %cst_15 : f32 to vector<16x128xf32>
    %25 = arith.addf %24, %23 : vector<16x128xf32>
    %26 = arith.divf %24, %25 : vector<16x128xf32>
    %27 = vector.extract_strided_slice %26 {offsets = [0, 0], sizes = [16, 32], strides = [1, 1]} : vector<16x128xf32> to vector<16x32xf32>
    %28 = vector.extract_strided_slice %26 {offsets = [0, 32], sizes = [16, 32], strides = [1, 1]} : vector<16x128xf32> to vector<16x32xf32>
    %29 = vector.extract_strided_slice %26 {offsets = [0, 64], sizes = [16, 32], strides = [1, 1]} : vector<16x128xf32> to vector<16x32xf32>
    %30 = vector.extract_strided_slice %21 {offsets = [0, 96], sizes = [16, 32], strides = [1, 1]} : vector<16x128xf32> to vector<16x32xf32>
    %31 = arith.mulf %16, %17 : vector<16x32xf32>
    %32 = arith.addf %30, %31 : vector<16x32xf32>
    %33 = math.tanh %32 : vector<16x32xf32>
    %34 = arith.mulf %27, %33 : vector<16x32xf32>
    %35 = arith.mulf %29, %17 : vector<16x32xf32>
    %36 = arith.addf %34, %35 : vector<16x32xf32>
    %37 = math.tanh %36 : vector<16x32xf32>
    %38 = arith.mulf %28, %37 : vector<16x32xf32>
    %39 = vector.extract_strided_slice %12 {offsets = [16, 0], sizes = [16, 128], strides = [1, 1]} : vector<128x128xf32> to vector<16x128xf32>
    %cst_16 = arith.constant dense<0.000000e+00> : vector<16x128xf32>
    %40 = tpu.matmul %38, %13, %cst_16 {dimension_numbers = #tpu.dot_dimension_numbers<[1], [0], [0], [1], [0, 0, 1, 1], [], []>} : vector<16x32xf32>, vector<32x128xf32>, vector<16x128xf32> -> vector<16x128xf32>
    %41 = arith.addf %39, %40 : vector<16x128xf32>
    %42 = arith.negf %41 : vector<16x128xf32>
    %43 = math.exp %42 : vector<16x128xf32>
    %cst_17 = arith.constant 1.000000e+00 : f32
    %44 = vector.broadcast %cst_17 : f32 to vector<16x128xf32>
    %45 = arith.addf %44, %43 : vector<16x128xf32>
    %46 = arith.divf %44, %45 : vector<16x128xf32>
    %47 = vector.extract_strided_slice %46 {offsets = [0, 0], sizes = [16, 32], strides = [1, 1]} : vector<16x128xf32> to vector<16x32xf32>
    %48 = vector.extract_strided_slice %46 {offsets = [0, 32], sizes = [16, 32], strides = [1, 1]} : vector<16x128xf32> to vector<16x32xf32>
    %49 = vector.extract_strided_slice %46 {offsets = [0, 64], sizes = [16, 32], strides = [1, 1]} : vector<16x128xf32> to vector<16x32xf32>
    %50 = vector.extract_strided_slice %41 {offsets = [0, 96], sizes = [16, 32], strides = [1, 1]} : vector<16x128xf32> to vector<16x32xf32>
    %51 = arith.mulf %16, %36 : vector<16x32xf32>
    %52 = arith.addf %50, %51 : vector<16x32xf32>
    %53 = math.tanh %52 : vector<16x32xf32>
    %54 = arith.mulf %47, %53 : vector<16x32xf32>
    %55 = arith.mulf %49, %36 : vector<16x32xf32>
    %56 = arith.addf %54, %55 : vector<16x32xf32>
    %57 = math.tanh %56 : vector<16x32xf32>
    %58 = arith.mulf %48, %57 : vector<16x32xf32>
    %59 = vector.extract_strided_slice %12 {offsets = [32, 0], sizes = [16, 128], strides = [1, 1]} : vector<128x128xf32> to vector<16x128xf32>
    %cst_18 = arith.constant dense<0.000000e+00> : vector<16x128xf32>
    %60 = tpu.matmul %58, %13, %cst_18 {dimension_numbers = #tpu.dot_dimension_numbers<[1], [0], [0], [1], [0, 0, 1, 1], [], []>} : vector<16x32xf32>, vector<32x128xf32>, vector<16x128xf32> -> vector<16x128xf32>
    %61 = arith.addf %59, %60 : vector<16x128xf32>
    %62 = arith.negf %61 : vector<16x128xf32>
    %63 = math.exp %62 : vector<16x128xf32>
    %cst_19 = arith.constant 1.000000e+00 : f32
    %64 = vector.broadcast %cst_19 : f32 to vector<16x128xf32>
    %65 = arith.addf %64, %63 : vector<16x128xf32>
    %66 = arith.divf %64, %65 : vector<16x128xf32>
    %67 = vector.extract_strided_slice %66 {offsets = [0, 0], sizes = [16, 32], strides = [1, 1]} : vector<16x128xf32> to vector<16x32xf32>
    %68 = vector.extract_strided_slice %66 {offsets = [0, 32], sizes = [16, 32], strides = [1, 1]} : vector<16x128xf32> to vector<16x32xf32>
    %69 = vector.extract_strided_slice %66 {offsets = [0, 64], sizes = [16, 32], strides = [1, 1]} : vector<16x128xf32> to vector<16x32xf32>
    %70 = vector.extract_strided_slice %61 {offsets = [0, 96], sizes = [16, 32], strides = [1, 1]} : vector<16x128xf32> to vector<16x32xf32>
    %71 = arith.mulf %16, %56 : vector<16x32xf32>
    %72 = arith.addf %70, %71 : vector<16x32xf32>
    %73 = math.tanh %72 : vector<16x32xf32>
    %74 = arith.mulf %67, %73 : vector<16x32xf32>
    %75 = arith.mulf %69, %56 : vector<16x32xf32>
    %76 = arith.addf %74, %75 : vector<16x32xf32>
    %77 = math.tanh %76 : vector<16x32xf32>
    %78 = arith.mulf %68, %77 : vector<16x32xf32>
    %79 = vector.extract_strided_slice %12 {offsets = [48, 0], sizes = [16, 128], strides = [1, 1]} : vector<128x128xf32> to vector<16x128xf32>
    %cst_20 = arith.constant dense<0.000000e+00> : vector<16x128xf32>
    %80 = tpu.matmul %78, %13, %cst_20 {dimension_numbers = #tpu.dot_dimension_numbers<[1], [0], [0], [1], [0, 0, 1, 1], [], []>} : vector<16x32xf32>, vector<32x128xf32>, vector<16x128xf32> -> vector<16x128xf32>
    %81 = arith.addf %79, %80 : vector<16x128xf32>
    %82 = arith.negf %81 : vector<16x128xf32>
    %83 = math.exp %82 : vector<16x128xf32>
    %cst_21 = arith.constant 1.000000e+00 : f32
    %84 = vector.broadcast %cst_21 : f32 to vector<16x128xf32>
    %85 = arith.addf %84, %83 : vector<16x128xf32>
    %86 = arith.divf %84, %85 : vector<16x128xf32>
    %87 = vector.extract_strided_slice %86 {offsets = [0, 0], sizes = [16, 32], strides = [1, 1]} : vector<16x128xf32> to vector<16x32xf32>
    %88 = vector.extract_strided_slice %86 {offsets = [0, 32], sizes = [16, 32], strides = [1, 1]} : vector<16x128xf32> to vector<16x32xf32>
    %89 = vector.extract_strided_slice %86 {offsets = [0, 64], sizes = [16, 32], strides = [1, 1]} : vector<16x128xf32> to vector<16x32xf32>
    %90 = vector.extract_strided_slice %81 {offsets = [0, 96], sizes = [16, 32], strides = [1, 1]} : vector<16x128xf32> to vector<16x32xf32>
    %91 = arith.mulf %16, %76 : vector<16x32xf32>
    %92 = arith.addf %90, %91 : vector<16x32xf32>
    %93 = math.tanh %92 : vector<16x32xf32>
    %94 = arith.mulf %87, %93 : vector<16x32xf32>
    %95 = arith.mulf %89, %76 : vector<16x32xf32>
    %96 = arith.addf %94, %95 : vector<16x32xf32>
    %97 = math.tanh %96 : vector<16x32xf32>
    %98 = arith.mulf %88, %97 : vector<16x32xf32>
    %99 = vector.extract_strided_slice %12 {offsets = [64, 0], sizes = [16, 128], strides = [1, 1]} : vector<128x128xf32> to vector<16x128xf32>
    %cst_22 = arith.constant dense<0.000000e+00> : vector<16x128xf32>
    %100 = tpu.matmul %98, %13, %cst_22 {dimension_numbers = #tpu.dot_dimension_numbers<[1], [0], [0], [1], [0, 0, 1, 1], [], []>} : vector<16x32xf32>, vector<32x128xf32>, vector<16x128xf32> -> vector<16x128xf32>
    %101 = arith.addf %99, %100 : vector<16x128xf32>
    %102 = arith.negf %101 : vector<16x128xf32>
    %103 = math.exp %102 : vector<16x128xf32>
    %cst_23 = arith.constant 1.000000e+00 : f32
    %104 = vector.broadcast %cst_23 : f32 to vector<16x128xf32>
    %105 = arith.addf %104, %103 : vector<16x128xf32>
    %106 = arith.divf %104, %105 : vector<16x128xf32>
    %107 = vector.extract_strided_slice %106 {offsets = [0, 0], sizes = [16, 32], strides = [1, 1]} : vector<16x128xf32> to vector<16x32xf32>
    %108 = vector.extract_strided_slice %106 {offsets = [0, 32], sizes = [16, 32], strides = [1, 1]} : vector<16x128xf32> to vector<16x32xf32>
    %109 = vector.extract_strided_slice %106 {offsets = [0, 64], sizes = [16, 32], strides = [1, 1]} : vector<16x128xf32> to vector<16x32xf32>
    %110 = vector.extract_strided_slice %101 {offsets = [0, 96], sizes = [16, 32], strides = [1, 1]} : vector<16x128xf32> to vector<16x32xf32>
    %111 = arith.mulf %16, %96 : vector<16x32xf32>
    %112 = arith.addf %110, %111 : vector<16x32xf32>
    %113 = math.tanh %112 : vector<16x32xf32>
    %114 = arith.mulf %107, %113 : vector<16x32xf32>
    %115 = arith.mulf %109, %96 : vector<16x32xf32>
    %116 = arith.addf %114, %115 : vector<16x32xf32>
    %117 = math.tanh %116 : vector<16x32xf32>
    %118 = arith.mulf %108, %117 : vector<16x32xf32>
    %119 = vector.extract_strided_slice %12 {offsets = [80, 0], sizes = [16, 128], strides = [1, 1]} : vector<128x128xf32> to vector<16x128xf32>
    %cst_24 = arith.constant dense<0.000000e+00> : vector<16x128xf32>
    %120 = tpu.matmul %118, %13, %cst_24 {dimension_numbers = #tpu.dot_dimension_numbers<[1], [0], [0], [1], [0, 0, 1, 1], [], []>} : vector<16x32xf32>, vector<32x128xf32>, vector<16x128xf32> -> vector<16x128xf32>
    %121 = arith.addf %119, %120 : vector<16x128xf32>
    %122 = arith.negf %121 : vector<16x128xf32>
    %123 = math.exp %122 : vector<16x128xf32>
    %cst_25 = arith.constant 1.000000e+00 : f32
    %124 = vector.broadcast %cst_25 : f32 to vector<16x128xf32>
    %125 = arith.addf %124, %123 : vector<16x128xf32>
    %126 = arith.divf %124, %125 : vector<16x128xf32>
    %127 = vector.extract_strided_slice %126 {offsets = [0, 0], sizes = [16, 32], strides = [1, 1]} : vector<16x128xf32> to vector<16x32xf32>
    %128 = vector.extract_strided_slice %126 {offsets = [0, 32], sizes = [16, 32], strides = [1, 1]} : vector<16x128xf32> to vector<16x32xf32>
    %129 = vector.extract_strided_slice %126 {offsets = [0, 64], sizes = [16, 32], strides = [1, 1]} : vector<16x128xf32> to vector<16x32xf32>
    %130 = vector.extract_strided_slice %121 {offsets = [0, 96], sizes = [16, 32], strides = [1, 1]} : vector<16x128xf32> to vector<16x32xf32>
    %131 = arith.mulf %16, %116 : vector<16x32xf32>
    %132 = arith.addf %130, %131 : vector<16x32xf32>
    %133 = math.tanh %132 : vector<16x32xf32>
    %134 = arith.mulf %127, %133 : vector<16x32xf32>
    %135 = arith.mulf %129, %116 : vector<16x32xf32>
    %136 = arith.addf %134, %135 : vector<16x32xf32>
    %137 = math.tanh %136 : vector<16x32xf32>
    %138 = arith.mulf %128, %137 : vector<16x32xf32>
    %139 = vector.extract_strided_slice %12 {offsets = [96, 0], sizes = [16, 128], strides = [1, 1]} : vector<128x128xf32> to vector<16x128xf32>
    %cst_26 = arith.constant dense<0.000000e+00> : vector<16x128xf32>
    %140 = tpu.matmul %138, %13, %cst_26 {dimension_numbers = #tpu.dot_dimension_numbers<[1], [0], [0], [1], [0, 0, 1, 1], [], []>} : vector<16x32xf32>, vector<32x128xf32>, vector<16x128xf32> -> vector<16x128xf32>
    %141 = arith.addf %139, %140 : vector<16x128xf32>
    %142 = arith.negf %141 : vector<16x128xf32>
    %143 = math.exp %142 : vector<16x128xf32>
    %cst_27 = arith.constant 1.000000e+00 : f32
    %144 = vector.broadcast %cst_27 : f32 to vector<16x128xf32>
    %145 = arith.addf %144, %143 : vector<16x128xf32>
    %146 = arith.divf %144, %145 : vector<16x128xf32>
    %147 = vector.extract_strided_slice %146 {offsets = [0, 0], sizes = [16, 32], strides = [1, 1]} : vector<16x128xf32> to vector<16x32xf32>
    %148 = vector.extract_strided_slice %146 {offsets = [0, 32], sizes = [16, 32], strides = [1, 1]} : vector<16x128xf32> to vector<16x32xf32>
    %149 = vector.extract_strided_slice %146 {offsets = [0, 64], sizes = [16, 32], strides = [1, 1]} : vector<16x128xf32> to vector<16x32xf32>
    %150 = vector.extract_strided_slice %141 {offsets = [0, 96], sizes = [16, 32], strides = [1, 1]} : vector<16x128xf32> to vector<16x32xf32>
    %151 = arith.mulf %16, %136 : vector<16x32xf32>
    %152 = arith.addf %150, %151 : vector<16x32xf32>
    %153 = math.tanh %152 : vector<16x32xf32>
    %154 = arith.mulf %147, %153 : vector<16x32xf32>
    %155 = arith.mulf %149, %136 : vector<16x32xf32>
    %156 = arith.addf %154, %155 : vector<16x32xf32>
    %157 = math.tanh %156 : vector<16x32xf32>
    %158 = arith.mulf %148, %157 : vector<16x32xf32>
    %159 = vector.extract_strided_slice %12 {offsets = [112, 0], sizes = [16, 128], strides = [1, 1]} : vector<128x128xf32> to vector<16x128xf32>
    %cst_28 = arith.constant dense<0.000000e+00> : vector<16x128xf32>
    %160 = tpu.matmul %158, %13, %cst_28 {dimension_numbers = #tpu.dot_dimension_numbers<[1], [0], [0], [1], [0, 0, 1, 1], [], []>} : vector<16x32xf32>, vector<32x128xf32>, vector<16x128xf32> -> vector<16x128xf32>
    %161 = arith.addf %159, %160 : vector<16x128xf32>
    %162 = arith.negf %161 : vector<16x128xf32>
    %163 = math.exp %162 : vector<16x128xf32>
    %cst_29 = arith.constant 1.000000e+00 : f32
    %164 = vector.broadcast %cst_29 : f32 to vector<16x128xf32>
    %165 = arith.addf %164, %163 : vector<16x128xf32>
    %166 = arith.divf %164, %165 : vector<16x128xf32>
    %167 = vector.extract_strided_slice %166 {offsets = [0, 0], sizes = [16, 32], strides = [1, 1]} : vector<16x128xf32> to vector<16x32xf32>
    %168 = vector.extract_strided_slice %166 {offsets = [0, 32], sizes = [16, 32], strides = [1, 1]} : vector<16x128xf32> to vector<16x32xf32>
    %169 = vector.extract_strided_slice %166 {offsets = [0, 64], sizes = [16, 32], strides = [1, 1]} : vector<16x128xf32> to vector<16x32xf32>
    %170 = vector.extract_strided_slice %161 {offsets = [0, 96], sizes = [16, 32], strides = [1, 1]} : vector<16x128xf32> to vector<16x32xf32>
    %171 = arith.mulf %16, %156 : vector<16x32xf32>
    %172 = arith.addf %170, %171 : vector<16x32xf32>
    %173 = math.tanh %172 : vector<16x32xf32>
    %174 = arith.mulf %167, %173 : vector<16x32xf32>
    %175 = arith.mulf %169, %156 : vector<16x32xf32>
    %176 = arith.addf %174, %175 : vector<16x32xf32>
    %177 = math.tanh %176 : vector<16x32xf32>
    %178 = arith.mulf %168, %177 : vector<16x32xf32>
    %179 = vector.extract_strided_slice %178 {offsets = [0, 0], sizes = [8, 32], strides = [1, 1]} : vector<16x32xf32> to vector<8x32xf32>
    %180 = vector.extract_strided_slice %178 {offsets = [8, 0], sizes = [8, 32], strides = [1, 1]} : vector<16x32xf32> to vector<8x32xf32>
    %181 = arith.mulf %179, %180 : vector<8x32xf32>
    %182 = arith.subf %179, %180 : vector<8x32xf32>
    %183 = math.absf %182 : vector<8x32xf32>
    %184 = tpu.concatenate %181, %183 in 1 : vector<8x32xf32>, vector<8x32xf32> -> vector<8x64xf32>
    %c0_30 = arith.constant 0 : index
    %c0_31 = arith.constant 0 : index
    %185 = vector.load %arg6[%c0_30, %c0_31] : memref<64x32xf32, #tpu.memory_space<vmem>>, vector<64x32xf32>
    %cst_32 = arith.constant dense<0.000000e+00> : vector<8x32xf32>
    %186 = tpu.matmul %184, %185, %cst_32 {dimension_numbers = #tpu.dot_dimension_numbers<[1], [0], [0], [1], [0, 0, 1, 1], [], []>} : vector<8x64xf32>, vector<64x32xf32>, vector<8x32xf32> -> vector<8x32xf32>
    %c0_33 = arith.constant 0 : index
    %c0_34 = arith.constant 0 : index
    %187 = vector.load %arg7[%c0_33, %c0_34] : memref<1x32xf32, #tpu.memory_space<vmem>>, vector<1x32xf32>
    %188 = vector.broadcast %187 : vector<1x32xf32> to vector<8x32xf32>
    %189 = arith.addf %186, %188 : vector<8x32xf32>
    %cst_35 = arith.constant 0.000000e+00 : f32
    %190 = vector.broadcast %cst_35 : f32 to vector<8x32xf32>
    %191 = arith.maximumf %189, %190 : vector<8x32xf32>
    %c0_36 = arith.constant 0 : index
    %c0_37 = arith.constant 0 : index
    %192 = vector.load %arg8[%c0_36, %c0_37] : memref<32x128xf32, #tpu.memory_space<vmem>>, vector<32x128xf32>
    %cst_38 = arith.constant dense<0.000000e+00> : vector<8x128xf32>
    %193 = tpu.matmul %191, %192, %cst_38 {dimension_numbers = #tpu.dot_dimension_numbers<[1], [0], [0], [1], [0, 0, 1, 1], [], []>} : vector<8x32xf32>, vector<32x128xf32>, vector<8x128xf32> -> vector<8x128xf32>
    %c0_39 = arith.constant 0 : index
    %c0_40 = arith.constant 0 : index
    %194 = vector.load %arg9[%c0_39, %c0_40] : memref<1x128xf32, #tpu.memory_space<vmem>>, vector<1x128xf32>
    %195 = vector.broadcast %194 : vector<1x128xf32> to vector<8x128xf32>
    %196 = arith.addf %193, %195 : vector<8x128xf32>
    %c0_41 = arith.constant 0 : index
    %c0_42 = arith.constant 0 : index
    %c0_43 = arith.constant 0 : index
    %197 = vector.load %arg10[%c0_41, %c0_42, %c0_43] : memref<1x8x128xf32, #tpu.memory_space<vmem>>, vector<1x8x128xf32>
    %198 = vector.shape_cast %197 : vector<1x8x128xf32> to vector<8x128xf32>
    %199 = vector.shape_cast %196 : vector<8x128xf32> to vector<1x8x128xf32>
    tpu.vector_store %arg10[%c0_41, %c0_42, %c0_43], %199 {strides = array<i32>} : memref<1x8x128xf32, #tpu.memory_space<vmem>>, vector<1x8x128xf32>,
    return
  }
  func.func @transform_0(%arg0: i32) -> (i32, i32, i32) {
    %c0_i32 = arith.constant 0 : i32
    %c0_i32_0 = arith.constant 0 : i32
    %c0_i32_1 = arith.constant 0 : i32
    return %arg0, %c0_i32, %c0_i32_0 : i32, i32, i32
  }
  func.func @transform_1(%arg0: i32) -> (i32, i32) {
    %c0_i32 = arith.constant 0 : i32
    %c0_i32_0 = arith.constant 0 : i32
    %c0_i32_1 = arith.constant 0 : i32
    return %c0_i32, %c0_i32_0 : i32, i32
  }
  func.func @transform_2(%arg0: i32) -> (i32, i32) {
    %c0_i32 = arith.constant 0 : i32
    %c0_i32_0 = arith.constant 0 : i32
    %c0_i32_1 = arith.constant 0 : i32
    return %c0_i32, %c0_i32_0 : i32, i32
  }
  func.func @transform_3(%arg0: i32) -> (i32, i32) {
    %c0_i32 = arith.constant 0 : i32
    %c0_i32_0 = arith.constant 0 : i32
    %c0_i32_1 = arith.constant 0 : i32
    return %c0_i32, %c0_i32_0 : i32, i32
  }
  func.func @transform_4(%arg0: i32) -> (i32, i32) {
    %c0_i32 = arith.constant 0 : i32
    %c0_i32_0 = arith.constant 0 : i32
    %c0_i32_1 = arith.constant 0 : i32
    return %c0_i32, %c0_i32_0 : i32, i32
  }
  func.func @transform_5(%arg0: i32) -> (i32, i32) {
    %c0_i32 = arith.constant 0 : i32
    %c0_i32_0 = arith.constant 0 : i32
    %c0_i32_1 = arith.constant 0 : i32
    return %c0_i32, %c0_i32_0 : i32, i32
  }
  func.func @transform_6(%arg0: i32) -> (i32, i32) {
    %c0_i32 = arith.constant 0 : i32
    %c0_i32_0 = arith.constant 0 : i32
    %c0_i32_1 = arith.constant 0 : i32
    return %c0_i32, %c0_i32_0 : i32, i32
  }
  func.func @transform_7(%arg0: i32) -> (i32, i32) {
    %c0_i32 = arith.constant 0 : i32
    %c0_i32_0 = arith.constant 0 : i32
    %c0_i32_1 = arith.constant 0 : i32
    return %c0_i32, %c0_i32_0 : i32, i32
  }
  func.func @transform_8(%arg0: i32) -> (i32, i32) {
    %c0_i32 = arith.constant 0 : i32
    %c0_i32_0 = arith.constant 0 : i32
    %c0_i32_1 = arith.constant 0 : i32
    return %c0_i32, %c0_i32_0 : i32, i32
  }
  func.func @transform_9(%arg0: i32) -> (i32, i32, i32) {
    %c0_i32 = arith.constant 0 : i32
    %c0_i32_0 = arith.constant 0 : i32
    %c0_i32_1 = arith.constant 0 : i32
    return %arg0, %c0_i32, %c0_i32_0 : i32, i32, i32
  }
}

</mosaic_0001>

<bundles_post_ra>
// kernel: sent_pair_forward.1
= control target key start
LH: loop header
LB: loop body
LE: loop exit
PB: predicated region body
PF: predicated region fallthrough
CT: control target
= control target key end

     0   :  { %s2001_s30 = smov 0   ;;  %s2399_s0 = inlined_call_operand.vmem [shape: s32[2,128,1], index: 0, kind: input, shape index: {}]   ;;  %s2400_s1 = inlined_call_operand.vmem [shape: f32[64,128], index: 1, kind: input, shape index: {}]   ;;  %s2401_s2 = inlined_call_operand.vmem [shape: f32[1,128], index: 2, kind: input, shape index: {}]   ;;  %s2402_s3 = inlined_call_operand.vmem [shape: f32[32,128], index: 3, kind: input, shape index: {}]   ;;  %s2403_s4 = inlined_call_operand.vmem [shape: f32[1,32], index: 4, kind: input, shape index: {}]   ;;  %s2404_s5 = inlined_call_operand.vmem [shape: f32[64,32], index: 5, kind: input, shape index: {}]   ;;  %s2405_s6 = inlined_call_operand.vmem [shape: f32[1,32], index: 6, kind: input, shape index: {}]   ;;  %s2406_s7 = inlined_call_operand.vmem [shape: f32[32,128], index: 7, kind: input, shape index: {}]   ;;  %s2407_s8 = inlined_call_operand.vmem [shape: f32[1,128], index: 8, kind: input, shape index: {}]   ;;  %s2408_s9 = inlined_call_operand.vmem [shape: f32[2,8,128], index: 9, kind: output, shape index: {}]  }
   0x1 LB: > { %s1705_s10 = sadd.s32 4294967295, %s1944_s30   ;;  %p1709_p0 = scmp.ge.s32.totalorder %s1944_s30, 1  ;;  %s1944_s30 = sphi %s2001_s30, %s19_s30  }
   0x2   : > { %p287_p1 = scmp.lt.s32.totalorder %s1944_s30, 3 }
   0x4   : > { %p288_p2 = pnand %p1709_p0, %p287_p1 }
   0x5   : > { %p322_p3 = scmp.lt.s32.totalorder (!%p288_p2), %s1705_s10, 1  ;;  %s1948_s23 = smov (!%p288_p2), 96  }
   0x6   : > { %291 = sbr.rel (%p288_p2) target bundleno = 4470 (0x1176), region = 56  ;;  %s1949_s26 = smov (!%p288_p2), 32  }
   0x7   : > { %s1950_s27 = smov (!%p288_p2), 64  }
   0xb   : > { %v436_v0 = vld [vmem:[%s2400_s1 + $0x38] sm:$0xff]  ;;  %v1946_v1 = vmov 0   ;;  %v435_v2 = vld [vmem:[%s2400_s1 + $0x30] sm:$0xff]  ;;  %s2410_s10 = smov (!%p322_p3, %s1705_s10), 1  ;;  %v434_v3 = vld [vmem:[%s2400_s1 + $0x28] sm:$0xff]  ;;  %v347_v18 = vlaneseq  ;;  %vm441_vm0 = vcmask 523264  }
   0xc   : > { %1801 = vset.pattern.permute.xlu0 %v1946_v1  ;;  %1802 = vset.pattern.permute.xlu1 %v1946_v1  ;;  %s1763_s17 = sshll.u32 %s2410_s10, 7  ;;  %v433_v4 = vld [vmem:[%s2400_s1 + $0x20] sm:$0xff]  ;;  %v432_v8 = vld [vmem:[%s2400_s1 + $0x18] sm:$0xff]  ;;  %v431_v9 = vld [vmem:[%s2400_s1 + $0x10] sm:$0xff]  ;;  %v1947_v22 = vmov 0.0   ;;  %s1712_s19 = sshll.u32 %s2410_s10, 3 }
   0xd   : > { %1803 = vset.pattern.permute.xlu2 %v1946_v1  ;;  %1764 = vmatpush.msra.mxu1 %v436_v0  ;;  %s2024_s20 = scalar_lea.vmem %s2399_s0, %s1763_s17  ;;  %v430_v10 = vld [vmem:[%s2400_s1 + $0x8] sm:$0xff]  ;;  %v429_v13 = vld [vmem:[%s2400_s1] sm:$0xff]  ;;  %v2049_v14 = vld [vmem:[%s2402_s3 + $0x18] sm:$0xff]  ;;  %v2078_v19 = vand.u32 127, %v347_v18 }
   0xe   : > { %498 = vmatpush.msra.mxu0 %v436_v0  ;;  %1765 = vmatpush.msra.mxu2 %v436_v0  ;;  %v339_v5 = vld [vmem:[%s2024_s20 + $0x40] sm:$0xff]  ;;  %v341_v6 = vld [vmem:[%s2024_s20 + $0x50] sm:$0xff]  ;;  %v332_v7 = vld [vmem:[%s2024_s20 + $0x8] sm:$0xff] }
   0xf   : > { %1767 = vmatpush.msra.mxu1 %v435_v2  ;;  %1766 = vmatpush.msra.mxu3 %v436_v0  ;;  %v340_v11 = vld [vmem:[%s2024_s20 + $0x48] sm:$0xff]  ;;  %v331_v12 = vld [vmem:[%s2024_s20] sm:$0xff]  ;;  %v2057_v15 = vld [vmem:[%s2402_s3 + $0x10] sm:$0xff] }
  0x10   : > { %499 = vmatpush.msra.mxu0 %v435_v2  ;;  %1768 = vmatpush.msra.mxu2 %v435_v2  ;;  %v2063_v16 = vld [vmem:[%s2402_s3 + $0x8] sm:$0xff]  ;;  %v2073_v17 = vld [vmem:[%s2402_s3] sm:$0xff]  ;;  %v342_v18 = vld [vmem:[%s2024_s20 + $0x58] sm:$0xff] }
  0x11   : > { %1770 = vmatpush.msra.mxu1 %v434_v3  ;;  %1769 = vmatpush.msra.mxu3 %v435_v2  ;;  %v2086_v24 = vld [vmem:[%s2403_s4] ss:$0 sm:$0xff] }
  0x12   : > { %374 = vperm.xlu0 %1801, %v339_v5   ;;  %380 = vperm.xlu1 %1802, %v341_v6   ;;  %v630_v25 = vmul.f32 0.0, %v2086_v24  ;;  %v2121_v37 = vld [vmem:[%s2401_s2] ss:$0 sm:$0xff] }
  0x13   : > { %353 = vperm.xlu2 %1803, %v332_v7   ;;  %1773 = vmatpush.msra.mxu1 %v433_v4 }
  0x14   : > { %500 = vmatpush.msra.mxu0 %v434_v3  ;;  %1771 = vmatpush.msra.mxu2 %v434_v3 }
  0x15   : > { %1776 = vmatpush.msra.mxu1 %v432_v8  ;;  %1772 = vmatpush.msra.mxu3 %v434_v3 }
  0x16   : > { %501 = vmatpush.msra.mxu0 %v433_v4  ;;  %1774 = vmatpush.msra.mxu2 %v433_v4 }
  0x17   : > { %1779 = vmatpush.msra.mxu1 %v431_v9  ;;  %1775 = vmatpush.msra.mxu3 %v433_v4 }
  0x18   : > { %502 = vmatpush.msra.mxu0 %v432_v8  ;;  %1777 = vmatpush.msra.mxu2 %v432_v8 }
  0x19   : > { %1782 = vmatpush.msra.mxu1 %v430_v10  ;;  %1778 = vmatpush.msra.mxu3 %v432_v8 }
  0x1a   : > { %377 = vperm.xlu0 %1801, %v340_v11   ;;  %350 = vperm.xlu1 %1802, %v331_v12  }
  0x1b   : > { %503 = vmatpush.msra.mxu0 %v431_v9  ;;  %1780 = vmatpush.msra.mxu2 %v431_v9 }
  0x1c   : > { %1781 = vmatpush.msra.mxu3 %v431_v9  ;;  %1785 = vmatpush.msra.mxu1 %v429_v13 }
  0x1d   : > { %504 = vmatpush.msra.mxu0 %v430_v10  ;;  %1783 = vmatpush.msra.mxu2 %v430_v10 }
  0x1e   : > { %1784 = vmatpush.msra.mxu3 %v430_v10  ;;  %579 = vmatpush.msrb.mxu1 %v2049_v14 }
  0x1f   : > { %505 = vmatpush.msra.mxu0 %v429_v13  ;;  %1786 = vmatpush.msra.mxu2 %v429_v13 }
  0x20   : > { %1787 = vmatpush.msra.mxu3 %v429_v13  ;;  %580 = vmatpush.msrb.mxu1 %v2057_v15 }
  0x21   : > { %695 = vmatpush.msrb.mxu2 %v2049_v14  ;;  %632 = vrot.lane.b32.xlu2 %v630_v25, %s1948_s23 }
  0x22   : > { %824 = vmatpush.msrb.mxu3 %v2049_v14  ;;  %581 = vmatpush.msrb.mxu1 %v2063_v16 }
  0x23   : > { %696 = vmatpush.msrb.mxu2 %v2057_v15 }
  0x24   : > { %825 = vmatpush.msrb.mxu3 %v2057_v15  ;;  %582 = vmatpush.msrb.mxu1 %v2073_v17 }
  0x25   : > { %697 = vmatpush.msrb.mxu2 %v2063_v16 }
  0x26   : > { %826 = vmatpush.msrb.mxu3 %v2063_v16 }
  0x27   : > { %698 = vmatpush.msrb.mxu2 %v2073_v17 }
  0x28   : > { %827 = vmatpush.msrb.mxu3 %v2073_v17 }
  0x6d   : > { %v354_v30 = vpop.permute.xlu2 %353 }
  0x6e   : > { %vm398_vm4 = vcmp.eq.s32.totalorder %v354_v30, %v2078_v19 }
  0x6f   : > { %v414_v31 = vsel %vm398_vm4, 1.0, %v1947_v22 }
  0x7b   : > { %v633_v40 = vpop.permute.xlu2 %632 }
  0x84   : > { %v375_v20 = vpop.permute.xlu0 %374  ;;  %v381_v21 = vpop.permute.xlu1 %380 }
  0x85   : > { %vm405_vm1 = vcmp.eq.s32.totalorder %v375_v20, %v2078_v19  ;;  %vm407_vm5 = vcmp.eq.s32.totalorder %v381_v21, %v2078_v19 }
  0x86   : > { %v421_v23 = vsel %vm405_vm1, 1.0, %v1947_v22  ;;  %v423_v32 = vsel %vm407_vm5, 1.0, %v1947_v22 }
  0x87   : > { %1721 = vmatmul.msk.f32.vlgmr.msra.gmra.mxu1 %vm441_vm0, %v421_v23 }
  0x88   : > { %953 = vmatpush.msra.mxu1 %v2049_v14 }
  0x8a   : > { %954 = vmatpush.msra.mxu1 %v2057_v15 }
  0x8c   : > { %v378_v26 = vpop.permute.xlu0 %377  ;;  %v351_v27 = vpop.permute.xlu1 %350  ;;  %955 = vmatpush.msra.mxu1 %v2063_v16 }
  0x8d   : > { %vm406_vm2 = vcmp.eq.s32.totalorder %v378_v26, %v2078_v19  ;;  %vm397_vm3 = vcmp.eq.s32.totalorder %v351_v27, %v2078_v19 }
  0x8e   : > { %v422_v28 = vsel %vm406_vm2, 1.0, %v1947_v22  ;;  %v413_v29 = vsel %vm397_vm3, 1.0, %v1947_v22  ;;  %956 = vmatpush.msra.mxu1 %v2073_v17  ;;  %vm563_vm3 = vcmask 261120  }
  0x8f   : > { %1722 = vmatmul.msk.f32.gmra.mxu1 %vm441_vm0, %v422_v28  ;;  %1713 = vmatmul.msk.f32.vlgmr.msra.gmra.mxu0 %vm441_vm0, %v413_v29 }
  0x97   : > { %1723 = vmatmul.msk.f32.gmra.mxu1 %vm441_vm0, %v423_v32  ;;  %1714 = vmatmul.msk.f32.gmra.mxu0 %vm441_vm0, %v414_v31  ;;  %v343_v31 = vld [vmem:[%s2024_s20 + $0x60] sm:$0xff] }
  0x9f   : > { %583 = vmatmul.f32.vlgmr.msrb.gmra.mxu1 %v1947_v22 }
  0xa0   : > { %1340 = vmatpush.msrb.mxu1 %v2049_v14 }
  0xa2   : > { %1341 = vmatpush.msrb.mxu1 %v2057_v15 }
  0xa4   : > { %1342 = vmatpush.msrb.mxu1 %v2063_v16 }
  0xa6   : > { %1343 = vmatpush.msrb.mxu1 %v2073_v17 }
  0xa7   : > { %586 = vmatmul.f32.gmra.mxu1 %v1947_v22 }
 0x104   : > { %v2112_v33 = vpop.f32.mrf.mxu1 }
 0x10c   : > { %v2114_v34 = vpop.f32.mrf.mxu1  ;;  %v507_v36 = vpop.f32.mrf.mxu0 }
 0x10d   : > { %v508_v38 = vadd.f32 %v2121_v37, %v507_v36 }
 0x114   : > { %v2116_v35 = vpop.f32.mrf.mxu1  ;;  %v510_v42 = vpop.f32.mrf.mxu0 }
 0x115   : > { %v511_v45 = vadd.f32 %v2121_v37, %v510_v42 }
 0x11c   : > { %v584_v39 = vpop.f32.mrf.mxu1 }
 0x11d   : > { %v590_v41 = vadd.f32 %v584_v39, %v508_v38  ;;  %v344_v39 = vld [vmem:[%s2024_s20 + $0x68] sm:$0xff] }
 0x11f   : > { %v1729_v43 = vmul.f32 -1.442695, %v590_v41  ;;  %v635_v44 = vadd.f32 %v633_v40, %v590_v41 }
 0x121   : > { %1808 = vpow2.f32 %v1729_v43 }
 0x122   : > { %1810 = vtanh.f32 %v635_v44 }
 0x124   : > { %v587_v46 = vpop.f32.mrf.mxu1 }
 0x125   : > { %v591_v47 = vadd.f32 %v587_v46, %v511_v45 }
 0x127   : > { %v1809_v48 = vpop.eup %1808  ;;  %v1730_v49 = vmul.f32 -1.442695, %v591_v47  ;;  %v636_v50 = vadd.f32 %v633_v40, %v591_v47  ;;  %v333_v40 = vld [vmem:[%s2024_s20 + $0x10] sm:$0xff] }
 0x128   : > { %v1811_v51 = vpop.eup %1810  ;;  %v598_v52 = vadd.f32 1.0, %v1809_v48  ;;  %v334_v48 = vld [vmem:[%s2024_s20 + $0x18] sm:$0xff] }
 0x129   : > { %1812 = vpow2.f32 %v1730_v49  ;;  %641 = vrot.lane.b32.xlu0 %v1811_v51, %s1949_s26 }
 0x12a   : > { %1814 = vrcp.f32 %v598_v52  ;;  %v611_v59 = vand.u32 2147483648, %v598_v52  ;;  %v609_v61 = vand.u32 2147483647, %v598_v52  ;;  %vm605_vm7 = vweird.f32 %v598_v52 }
 0x12b   : > { %1816 = vtanh.f32 %v636_v50 }
 0x12c   : > { %v612_v0 = vor.u32 1.1754944e-38, %v611_v59  ;;  %vm610_vm9 = vcmp.eq.f32.partialorder %v609_v61, 8.507059e+37 }
 0x12f   : > { %v1813_v53 = vpop.eup %1812 }
 0x130   : > { %v1815_v54 = vpop.eup %1814  ;;  %v599_v55 = vadd.f32 1.0, %v1813_v53 }
 0x131   : > { %v1817_v56 = vpop.eup %1816  ;;  %v601_v57 = vmul.f32 %v1815_v54, %v598_v52  ;;  %vm606_vm6 = vweird.f32 %v1815_v54 }
 0x132   : > { %1818 = vrcp.f32 %v599_v55  ;;  %643 = vrot.lane.b32.xlu2 %v1817_v56, %s1949_s26  ;;  %vm607_vm8 = vmor %vm605_vm7, %vm606_vm6  ;;  %vm620_vm10 = vweird.f32 %v599_v55  ;;  %v626_v4 = vand.u32 2147483648, %v599_v55  ;;  %v624_v7 = vand.u32 2147483647, %v599_v55 }
 0x133   : > { %v602_v58 = vsub.f32 1.0, %v601_v57 }
 0x134   : > { %v627_v9 = vor.u32 1.1754944e-38, %v626_v4  ;;  %vm625_vm13 = vcmp.eq.f32.partialorder %v624_v7, 8.507059e+37 }
 0x135   : > { %v603_v60 = vmul.f32 %v1815_v54, %v602_v58 }
 0x137   : > { %v604_v62 = vadd.f32 %v1815_v54, %v603_v60 }
 0x138   : > { %v1819_v63 = vpop.eup %1818 }
 0x139   : > { %v616_v1 = vmul.f32 %v1819_v63, %v599_v55  ;;  %v608_v2 = vsel %vm607_vm8, %v1815_v54, %v604_v62  ;;  %vm621_vm11 = vweird.f32 %v1819_v63 }
 0x13a   : > { %v613_v3 = vsel %vm610_vm9, %v612_v0, %v608_v2  ;;  %vm622_vm12 = vmor %vm620_vm10, %vm621_vm11 }
 0x13b   : > { %v649_v5 = vmul.f32 0.0, %v613_v3  ;;  %v617_v6 = vsub.f32 1.0, %v616_v1 }
 0x13d   : > { %653 = vrot.lane.b32.xlu1 %v649_v5, %s1950_s27  ;;  %v618_v8 = vmul.f32 %v1819_v63, %v617_v6 }
 0x13f   : > { %v619_v10 = vadd.f32 %v1819_v63, %v618_v8 }
 0x141   : > { %v623_v11 = vsel %vm622_vm12, %v1819_v63, %v619_v10 }
 0x142   : > { %v628_v12 = vsel %vm625_vm13, %v627_v9, %v623_v11 }
 0x143   : > { %v650_v13 = vmul.f32 0.0, %v628_v12 }
 0x145   : > { %655 = vrot.lane.b32.xlu0 %v650_v13, %s1950_s27 }
 0x14d   : > { %383 = vperm.xlu0 %1801, %v342_v18  }
 0x18c   : > { %v644_v26 = vpop.permute.xlu2 %643 }
 0x18d   : > { %v648_v27 = vmul.f32 %v644_v26, %v628_v12 }
 0x19b   : > { %v642_v20 = vpop.permute.xlu0 %641 }
 0x19c   : > { %v647_v21 = vmul.f32 %v642_v20, %v613_v3 }
 0x1af   : > { %v654_v23 = vpop.permute.xlu1 %653 }
 0x1b0   : > { %v659_v25 = vadd.f32 %v654_v23, %v647_v21 }
 0x1b2   : > { %1820 = vtanh.f32 %v659_v25  ;;  %v746_v41 = vmul.f32 %v2086_v24, %v659_v25 }
 0x1b7   : > { %v656_v28 = vpop.permute.xlu0 %655 }
 0x1b8   : > { %v1821_v29 = vpop.eup %1820  ;;  %v660_v30 = vadd.f32 %v656_v28, %v648_v27 }
 0x1b9   : > { %665 = vrot.lane.b32.xlu1 %v1821_v29, %s1949_s26 }
 0x1ba   : > { %1822 = vtanh.f32 %v660_v30  ;;  %v747_v44 = vmul.f32 %v2086_v24, %v660_v30 }
 0x1bf   : > { %v384_v32 = vpop.permute.xlu0 %383 }
 0x1c0   : > { %v1823_v36 = vpop.eup %1822  ;;  %vm408_vm14 = vcmp.eq.s32.totalorder %v384_v32, %v2078_v19 }
 0x1c1   : > { %v424_v38 = vsel %vm408_vm14, 1.0, %v1947_v22  ;;  %667 = vrot.lane.b32.xlu2 %v1823_v36, %s1949_s26  ;;  %386 = vperm.xlu1 %1802, %v343_v31  }
 0x1c2   : > { %1724 = vmatmul.msk.f32.vlgmr.msra.gmra.mxu2 %vm441_vm0, %v424_v38 }
 0x1c3   : > { %1082 = vmatpush.msra.mxu2 %v2049_v14 }
 0x1c5   : > { %1083 = vmatpush.msra.mxu2 %v2057_v15 }
 0x1c7   : > { %1084 = vmatpush.msra.mxu2 %v2063_v16 }
 0x1c9   : > { %389 = vperm.xlu2 %1803, %v344_v39   ;;  %356 = vperm.xlu1 %1802, %v333_v40  }
 0x1ca   : > { %1085 = vmatpush.msra.mxu2 %v2073_v17 }
 0x1d1   : > { %750 = vrot.lane.b32.xlu1 %v746_v41, %s1948_s23 }
 0x1d9   : > { %774 = vrot.lane.b32.xlu1 %v660_v30, %s1950_s27 }
 0x21b   : > { %v668_v42 = vpop.permute.xlu2 %667 }
 0x21c   : > { %v672_v43 = vmul.f32 %v668_v42, %v628_v12 }
 0x21e   : > { %677 = vrot.lane.b32.xlu2 %v672_v43, %s1948_s23 }
 0x223   : > { %v390_v50 = vpop.permute.xlu2 %389 }
 0x224   : > { %vm410_vm1 = vcmp.eq.s32.totalorder %v390_v50, %v2078_v19 }
 0x225   : > { %v426_v53 = vsel %vm410_vm1, 1.0, %v1947_v22 }
 0x226   : > { %752 = vrot.lane.b32.xlu2 %v747_v44, %s1948_s23 }
 0x22b   : > { %v666_v45 = vpop.permute.xlu1 %665 }
 0x22c   : > { %v671_v46 = vmul.f32 %v666_v45, %v613_v3 }
 0x22e   : > { %675 = vrot.lane.b32.xlu0 %v671_v46, %s1948_s23 }
 0x233   : > { %v387_v47 = vpop.permute.xlu1 %386 }
 0x234   : > { %vm409_vm15 = vcmp.eq.s32.totalorder %v387_v47, %v2078_v19 }
 0x235   : > { %v425_v49 = vsel %vm409_vm15, 1.0, %v1947_v22 }
 0x236   : > { %359 = vperm.xlu0 %1801, %v334_v48   ;;  %1725 = vmatmul.msk.f32.gmra.mxu2 %vm441_vm0, %v425_v49 }
 0x23b   : > { %v357_v51 = vpop.permute.xlu1 %356 }
 0x23c   : > { %vm399_vm2 = vcmp.eq.s32.totalorder %v357_v51, %v2078_v19 }
 0x23d   : > { %v415_v52 = vsel %vm399_vm2, 1.0, %v1947_v22 }
 0x23e   : > { %772 = vrot.lane.b32.xlu0 %v659_v25, %s1950_s27  ;;  %1715 = vmatmul.msk.f32.gmra.mxu0 %vm441_vm0, %v415_v52  ;;  %v345_v52 = vld [vmem:[%s2024_s20 + $0x70] sm:$0xff] }
 0x23f   : > { %1726 = vmatmul.msk.f32.gmra.mxu2 %vm441_vm0, %v426_v53  ;;  %v335_v53 = vld [vmem:[%s2024_s20 + $0x20] sm:$0xff] }
 0x243   : > { %v751_v1 = vpop.permute.xlu1 %750 }
 0x245   : > { %v2169_v58 = vpop.f32.mrf.mxu2 }
 0x24b   : > { %v775_v49 = vpop.permute.xlu1 %774 }
 0x278   : > { %v678_v55 = vpop.permute.xlu2 %677 }
 0x280   : > { %v753_v8 = vpop.permute.xlu2 %752 }
 0x2a0   : > { %v676_v54 = vpop.permute.xlu0 %675 }
 0x2a1   : > { %1731 = vmatmul.msk.f32.vlgmr.msrb.gmra.mxu2 %vm563_vm3, %v676_v54 }
 0x2a2   : > { %1469 = vmatpush.msrb.mxu2 %v2049_v14 }
 0x2a4   : > { %1470 = vmatpush.msrb.mxu2 %v2057_v15 }
 0x2a6   : > { %1471 = vmatpush.msrb.mxu2 %v2063_v16 }
 0x2a8   : > { %v360_v56 = vpop.permute.xlu0 %359  ;;  %1472 = vmatpush.msrb.mxu2 %v2073_v17 }
 0x2a9   : > { %vm400_vm4 = vcmp.eq.s32.totalorder %v360_v56, %v2078_v19  ;;  %1732 = vmatmul.msk.f32.gmra.mxu2 %vm563_vm3, %v678_v55 }
 0x2aa   : > { %v416_v57 = vsel %vm400_vm4, 1.0, %v1947_v22 }
 0x2ab   : > { %1716 = vmatmul.msk.f32.gmra.mxu0 %vm441_vm0, %v416_v57 }
 0x2b0   : > { %v773_v39 = vpop.permute.xlu0 %772 }
 0x2b9   : > { %v2171_v59 = vpop.f32.mrf.mxu2 }
 0x2bb   : > { %v513_v61 = vpop.f32.mrf.mxu0 }
 0x2bc   : > { %v514_v62 = vadd.f32 %v2121_v37, %v513_v61 }
 0x2c2   : > { %v2173_v60 = vpop.f32.mrf.mxu2 }
 0x324   : > { %v700_v63 = vpop.f32.mrf.mxu2 }
 0x325   : > { %v706_v0 = vadd.f32 %v700_v63, %v514_v62 }
 0x327   : > { %v1733_v2 = vmul.f32 -1.442695, %v706_v0  ;;  %v756_v3 = vadd.f32 %v751_v1, %v706_v0 }
 0x328   : > { %v516_v4 = vpop.f32.mrf.mxu0 }
 0x329   : > { %1824 = vpow2.f32 %v1733_v2  ;;  %v517_v5 = vadd.f32 %v2121_v37, %v516_v4 }
 0x32a   : > { %1826 = vtanh.f32 %v756_v3 }
 0x32c   : > { %v703_v6 = vpop.f32.mrf.mxu2 }
 0x32d   : > { %v707_v7 = vadd.f32 %v703_v6, %v517_v5 }
 0x32f   : > { %v1825_v9 = vpop.eup %1824  ;;  %v1734_v10 = vmul.f32 -1.442695, %v707_v7  ;;  %v757_v11 = vadd.f32 %v753_v8, %v707_v7 }
 0x330   : > { %v1827_v12 = vpop.eup %1826  ;;  %v714_v13 = vadd.f32 1.0, %v1825_v9 }
 0x331   : > { %1828 = vpow2.f32 %v1734_v10  ;;  %762 = vrot.lane.b32.xlu2 %v1827_v12, %s1949_s26 }
 0x332   : > { %1830 = vrcp.f32 %v714_v13  ;;  %v727_v27 = vand.u32 2147483648, %v714_v13  ;;  %v725_v29 = vand.u32 2147483647, %v714_v13  ;;  %vm721_vm6 = vweird.f32 %v714_v13 }
 0x333   : > { %1832 = vtanh.f32 %v757_v11  ;;  %v336_v11 = vld [vmem:[%s2024_s20 + $0x28] sm:$0xff] }
 0x334   : > { %v728_v32 = vor.u32 1.1754944e-38, %v727_v27  ;;  %vm726_vm8 = vcmp.eq.f32.partialorder %v725_v29, 8.507059e+37 }
 0x337   : > { %v1829_v18 = vpop.eup %1828 }
 0x338   : > { %v1831_v20 = vpop.eup %1830  ;;  %v715_v21 = vadd.f32 1.0, %v1829_v18 }
 0x339   : > { %v1833_v23 = vpop.eup %1832  ;;  %v717_v25 = vmul.f32 %v1831_v20, %v714_v13  ;;  %vm722_vm5 = vweird.f32 %v1831_v20 }
 0x33a   : > { %1834 = vrcp.f32 %v715_v21  ;;  %764 = vrot.lane.b32.xlu1 %v1833_v23, %s1949_s26  ;;  %vm723_vm7 = vmor %vm721_vm6, %vm722_vm5  ;;  %v742_v43 = vand.u32 2147483648, %v715_v21  ;;  %v740_v45 = vand.u32 2147483647, %v715_v21  ;;  %vm736_vm10 = vweird.f32 %v715_v21 }
 0x33b   : > { %v718_v26 = vsub.f32 1.0, %v717_v25 }
 0x33c   : > { %v743_v47 = vor.u32 1.1754944e-38, %v742_v43  ;;  %vm741_vm12 = vcmp.eq.f32.partialorder %v740_v45, 8.507059e+37 }
 0x33d   : > { %v719_v28 = vmul.f32 %v1831_v20, %v718_v26 }
 0x33f   : > { %v720_v30 = vadd.f32 %v1831_v20, %v719_v28 }
 0x340   : > { %v1835_v31 = vpop.eup %1834 }
 0x341   : > { %v732_v36 = vmul.f32 %v1835_v31, %v715_v21  ;;  %v724_v38 = vsel %vm723_vm7, %v1831_v20, %v720_v30  ;;  %vm737_vm9 = vweird.f32 %v1835_v31 }
 0x342   : > { %v729_v40 = vsel %vm726_vm8, %v728_v32, %v724_v38  ;;  %vm738_vm11 = vmor %vm736_vm10, %vm737_vm9 }
 0x343   : > { %v778_v41 = vmul.f32 %v773_v39, %v729_v40  ;;  %v733_v42 = vsub.f32 1.0, %v732_v36 }
 0x345   : > { %782 = vrot.lane.b32.xlu0 %v778_v41, %s1950_s27  ;;  %v734_v44 = vmul.f32 %v1835_v31, %v733_v42 }
 0x347   : > { %v735_v46 = vadd.f32 %v1835_v31, %v734_v44 }
 0x349   : > { %v739_v48 = vsel %vm738_vm11, %v1835_v31, %v735_v46 }
 0x34a   : > { %v744_v50 = vsel %vm741_vm12, %v743_v47, %v739_v48 }
 0x34b   : > { %v779_v51 = vmul.f32 %v775_v49, %v744_v50 }
 0x34d   : > { %784 = vrot.lane.b32.xlu2 %v779_v51, %s1950_s27 }
 0x355   : > { %392 = vperm.xlu2 %1803, %v345_v52  }
 0x35d   : > { %362 = vperm.xlu2 %1803, %v335_v53  }
 0x38b   : > { %v763_v54 = vpop.permute.xlu2 %762 }
 0x38c   : > { %v768_v0 = vmul.f32 %v763_v54, %v729_v40 }
 0x3a7   : > { %v785_v55 = vpop.permute.xlu2 %784 }
 0x3ac   : > { %v765_v56 = vpop.permute.xlu1 %764 }
 0x3ad   : > { %v769_v57 = vmul.f32 %v765_v56, %v744_v50 }
 0x3af   : > { %v789_v61 = vadd.f32 %v785_v55, %v769_v57  ;;  %v393_v62 = vpop.permute.xlu2 %392 }
 0x3b0   : > { %vm411_vm13 = vcmp.eq.s32.totalorder %v393_v62, %v2078_v19 }
 0x3b1   : > { %1836 = vtanh.f32 %v789_v61  ;;  %v427_v63 = vsel %vm411_vm13, 1.0, %v1947_v22  ;;  %v876_v8 = vmul.f32 %v2086_v24, %v789_v61 }
 0x3b2   : > { %1727 = vmatmul.msk.f32.vlgmr.msra.gmra.mxu3 %vm441_vm0, %v427_v63 }
 0x3b3   : > { %1211 = vmatpush.msra.mxu3 %v2049_v14 }
 0x3b5   : > { %1212 = vmatpush.msra.mxu3 %v2057_v15 }
 0x3b7   : > { %v1837_v1 = vpop.eup %1836  ;;  %v783_v2 = vpop.permute.xlu0 %782  ;;  %1213 = vmatpush.msra.mxu3 %v2063_v16  ;;  %v346_v16 = vld [vmem:[%s2024_s20 + $0x78] sm:$0xff] }
 0x3b8   : > { %v363_v3 = vpop.permute.xlu2 %362  ;;  %796 = vrot.lane.b32.xlu1 %v1837_v1, %s1949_s26  ;;  %v788_v4 = vadd.f32 %v783_v2, %v768_v0 }
 0x3b9   : > { %vm401_vm14 = vcmp.eq.s32.totalorder %v363_v3, %v2078_v19  ;;  %1214 = vmatpush.msra.mxu3 %v2073_v17 }
 0x3ba   : > { %v417_v5 = vsel %vm401_vm14, 1.0, %v1947_v22  ;;  %1838 = vtanh.f32 %v788_v4  ;;  %v875_v14 = vmul.f32 %v2086_v24, %v788_v4 }
 0x3bb   : > { %1717 = vmatmul.msk.f32.gmra.mxu0 %vm441_vm0, %v417_v5 }
 0x3bc   : > { %879 = vrot.lane.b32.xlu2 %v875_v14, %s1948_s23 }
 0x3c0   : > { %v1839_v15 = vpop.eup %1838 }
 0x3c1   : > { %794 = vrot.lane.b32.xlu0 %v1839_v15, %s1949_s26 }
 0x3c4   : > { %903 = vrot.lane.b32.xlu2 %v789_v61, %s1950_s27 }
 0x3c9   : > { %395 = vperm.xlu0 %1801, %v346_v16  }
 0x416   : > { %v880_v30 = vpop.permute.xlu2 %879 }
 0x42a   : > { %v797_v6 = vpop.permute.xlu1 %796 }
 0x42b   : > { %v801_v7 = vmul.f32 %v797_v6, %v744_v50 }
 0x42d   : > { %806 = vrot.lane.b32.xlu0 %v801_v7, %s1948_s23  ;;  %v904_v7 = vpop.permute.xlu2 %903 }
 0x433   : > { %v795_v17 = vpop.permute.xlu0 %794 }
 0x434   : > { %v800_v9 = vmul.f32 %v795_v17, %v729_v40 }
 0x435   : > { %881 = vrot.lane.b32.xlu0 %v876_v8, %s1948_s23  ;;  %v2213_v23 = vpop.f32.mrf.mxu3 }
 0x436   : > { %804 = vrot.lane.b32.xlu1 %v800_v9, %s1948_s23  ;;  %v337_v9 = vld [vmem:[%s2024_s20 + $0x30] sm:$0xff] }
 0x438   : > { %v519_v26 = vpop.f32.mrf.mxu0 }
 0x439   : > { %v520_v27 = vadd.f32 %v2121_v37, %v519_v26 }
 0x43b   : > { %v396_v10 = vpop.permute.xlu0 %395 }
 0x43c   : > { %vm412_vm15 = vcmp.eq.s32.totalorder %v396_v10, %v2078_v19 }
 0x43d   : > { %v428_v12 = vsel %vm412_vm15, 1.0, %v1947_v22 }
 0x43e   : > { %1728 = vmatmul.msk.f32.gmra.mxu3 %vm441_vm0, %v428_v12  ;;  %365 = vperm.xlu1 %1802, %v336_v11  }
 0x446   : > { %901 = vrot.lane.b32.xlu1 %v788_v4, %s1950_s27 }
 0x49f   : > { %v807_v18 = vpop.permute.xlu0 %806 }
 0x4a7   : > { %v882_v41 = vpop.permute.xlu0 %881 }
 0x4a8   : > { %v805_v13 = vpop.permute.xlu1 %804 }
 0x4a9   : > { %1735 = vmatmul.msk.f32.vlgmr.msrb.gmra.mxu3 %vm563_vm3, %v805_v13 }
 0x4b0   : > { %v366_v20 = vpop.permute.xlu1 %365 }
 0x4b1   : > { %vm402_vm1 = vcmp.eq.s32.totalorder %v366_v20, %v2078_v19  ;;  %1736 = vmatmul.msk.f32.gmra.mxu3 %vm563_vm3, %v807_v18 }
 0x4b2   : > { %v418_v21 = vsel %vm402_vm1, 1.0, %v1947_v22 }
 0x4b3   : > { %1718 = vmatmul.msk.f32.gmra.mxu0 %vm441_vm0, %v418_v21 }
 0x4b8   : > { %v902_v0 = vpop.permute.xlu1 %901 }
 0x4c1   : > { %v2215_v25 = vpop.f32.mrf.mxu3 }
 0x52c   : > { %v829_v28 = vpop.f32.mrf.mxu3 }
 0x52d   : > { %v835_v29 = vadd.f32 %v829_v28, %v520_v27 }
 0x52f   : > { %v1737_v31 = vmul.f32 -1.442695, %v835_v29  ;;  %v885_v32 = vadd.f32 %v880_v30, %v835_v29 }
 0x530   : > { %v522_v36 = vpop.f32.mrf.mxu0 }
 0x531   : > { %1840 = vpow2.f32 %v1737_v31  ;;  %v523_v38 = vadd.f32 %v2121_v37, %v522_v36  ;;  %v338_v31 = vld [vmem:[%s2024_s20 + $0x38] sm:$0xff] }
 0x532   : > { %1842 = vtanh.f32 %v885_v32 }
 0x534   : > { %v832_v39 = vpop.f32.mrf.mxu3 }
 0x535   : > { %v836_v40 = vadd.f32 %v832_v39, %v523_v38 }
 0x537   : > { %v1841_v42 = vpop.eup %1840  ;;  %v1738_v43 = vmul.f32 -1.442695, %v836_v40  ;;  %v886_v44 = vadd.f32 %v882_v41, %v836_v40 }
 0x538   : > { %v1843_v45 = vpop.eup %1842  ;;  %v843_v46 = vadd.f32 1.0, %v1841_v42 }
 0x539   : > { %1844 = vpow2.f32 %v1738_v43  ;;  %891 = vrot.lane.b32.xlu0 %v1843_v45, %s1949_s26 }
 0x53a   : > { %1846 = vrcp.f32 %v843_v46  ;;  %v856_v53 = vand.u32 2147483648, %v843_v46  ;;  %v854_v55 = vand.u32 2147483647, %v843_v46  ;;  %vm850_vm4 = vweird.f32 %v843_v46 }
 0x53b   : > { %1848 = vtanh.f32 %v886_v44 }
 0x53c   : > { %v857_v61 = vor.u32 1.1754944e-38, %v856_v53  ;;  %vm855_vm6 = vcmp.eq.f32.partialorder %v854_v55, 8.507059e+37 }
 0x53f   : > { %v1845_v47 = vpop.eup %1844 }
 0x540   : > { %v1847_v48 = vpop.eup %1846  ;;  %v844_v49 = vadd.f32 1.0, %v1845_v47 }
 0x541   : > { %v1849_v50 = vpop.eup %1848  ;;  %v846_v51 = vmul.f32 %v1847_v48, %v843_v46  ;;  %vm851_vm2 = vweird.f32 %v1847_v48 }
 0x542   : > { %1850 = vrcp.f32 %v844_v49  ;;  %893 = vrot.lane.b32.xlu2 %v1849_v50, %s1949_s26  ;;  %vm852_vm5 = vmor %vm850_vm4, %vm851_vm2  ;;  %v871_v4 = vand.u32 2147483648, %v844_v49  ;;  %v869_v14 = vand.u32 2147483647, %v844_v49  ;;  %vm865_vm8 = vweird.f32 %v844_v49 }
 0x543   : > { %v847_v52 = vsub.f32 1.0, %v846_v51 }
 0x544   : > { %v872_v16 = vor.u32 1.1754944e-38, %v871_v4  ;;  %vm870_vm10 = vcmp.eq.f32.partialorder %v869_v14, 8.507059e+37 }
 0x545   : > { %v848_v54 = vmul.f32 %v1847_v48, %v847_v52 }
 0x547   : > { %v849_v56 = vadd.f32 %v1847_v48, %v848_v54 }
 0x548   : > { %v1851_v57 = vpop.eup %1850 }
 0x549   : > { %v861_v62 = vmul.f32 %v1851_v57, %v844_v49  ;;  %v853_v63 = vsel %vm852_vm5, %v1847_v48, %v849_v56  ;;  %vm866_vm7 = vweird.f32 %v1851_v57 }
 0x54a   : > { %v858_v1 = vsel %vm855_vm6, %v857_v61, %v853_v63  ;;  %vm867_vm9 = vmor %vm865_vm8, %vm866_vm7 }
 0x54b   : > { %v907_v2 = vmul.f32 %v902_v0, %v858_v1  ;;  %v862_v3 = vsub.f32 1.0, %v861_v62 }
 0x54d   : > { %911 = vrot.lane.b32.xlu1 %v907_v2, %s1950_s27  ;;  %v863_v5 = vmul.f32 %v1851_v57, %v862_v3 }
 0x54f   : > { %v864_v15 = vadd.f32 %v1851_v57, %v863_v5 }
 0x551   : > { %v868_v6 = vsel %vm867_vm9, %v1851_v57, %v864_v15 }
 0x552   : > { %v873_v17 = vsel %vm870_vm10, %v872_v16, %v868_v6 }
 0x553   : > { %v908_v8 = vmul.f32 %v904_v7, %v873_v17 }
 0x555   : > { %913 = vrot.lane.b32.xlu0 %v908_v8, %s1950_s27 }
 0x55d   : > { %368 = vperm.xlu0 %1801, %v337_v9  }
 0x59c   : > { %v894_v18 = vpop.permute.xlu2 %893 }
 0x59d   : > { %v898_v20 = vmul.f32 %v894_v18, %v873_v17 }
 0x5ab   : > { %v892_v10 = vpop.permute.xlu0 %891 }
 0x5ac   : > { %v897_v11 = vmul.f32 %v892_v10, %v858_v1 }
 0x5bf   : > { %v912_v12 = vpop.permute.xlu1 %911 }
 0x5c0   : > { %v917_v13 = vadd.f32 %v912_v12, %v897_v11 }
 0x5c2   : > { %1852 = vtanh.f32 %v917_v13  ;;  %v1004_v43 = vmul.f32 %v2086_v24, %v917_v13 }
 0x5c7   : > { %v914_v21 = vpop.permute.xlu0 %913 }
 0x5c8   : > { %v1853_v26 = vpop.eup %1852  ;;  %v918_v27 = vadd.f32 %v914_v21, %v898_v20 }
 0x5c9   : > { %923 = vrot.lane.b32.xlu1 %v1853_v26, %s1949_s26 }
 0x5ca   : > { %1854 = vtanh.f32 %v918_v27  ;;  %v1005_v32 = vmul.f32 %v2086_v24, %v918_v27 }
 0x5cf   : > { %v369_v28 = vpop.permute.xlu0 %368 }
 0x5d0   : > { %v1855_v29 = vpop.eup %1854  ;;  %vm403_vm11 = vcmp.eq.s32.totalorder %v369_v28, %v2078_v19 }
 0x5d1   : > { %v419_v30 = vsel %vm403_vm11, 1.0, %v1947_v22  ;;  %925 = vrot.lane.b32.xlu2 %v1855_v29, %s1949_s26 }
 0x5d2   : > { %1719 = vmatmul.msk.f32.gmra.mxu0 %vm441_vm0, %v419_v30 }
 0x5d9   : > { %371 = vperm.xlu2 %1803, %v338_v31  }
 0x5e1   : > { %1010 = vrot.lane.b32.xlu2 %v1005_v32, %s1948_s23 }
 0x62b   : > { %v926_v36 = vpop.permute.xlu2 %925 }
 0x62c   : > { %v930_v38 = vmul.f32 %v926_v36, %v873_v17 }
 0x62e   : > { %935 = vrot.lane.b32.xlu0 %v930_v38, %s1948_s23 }
 0x633   : > { %v372_v39 = vpop.permute.xlu2 %371 }
 0x634   : > { %vm404_vm12 = vcmp.eq.s32.totalorder %v372_v39, %v2078_v19 }
 0x635   : > { %v420_v40 = vsel %vm404_vm12, 1.0, %v1947_v22 }
 0x636   : > { %1720 = vmatmul.msk.f32.gmra.mxu0 %vm441_vm0, %v420_v40  ;;  %1030 = vrot.lane.b32.xlu0 %v917_v13, %s1950_s27 }
 0x63b   : > { %v924_v41 = vpop.permute.xlu1 %923  ;;  %v1011_v55 = vpop.permute.xlu2 %1010 }
 0x63c   : > { %v929_v42 = vmul.f32 %v924_v41, %v858_v1 }
 0x63e   : > { %933 = vrot.lane.b32.xlu1 %v929_v42, %s1948_s23 }
 0x646   : > { %1008 = vrot.lane.b32.xlu1 %v1004_v43, %s1948_s23 }
 0x64e   : > { %1032 = vrot.lane.b32.xlu1 %v918_v27, %s1950_s27 }
 0x64f   : > { %v525_v22 = vpop.f32.mrf.mxu0 }
 0x650   : > { %v526_v45 = vadd.f32 %v2121_v37, %v525_v22 }
 0x6a0   : > { %v936_v19 = vpop.permute.xlu0 %935 }
 0x6a8   : > { %v1031_v10 = vpop.permute.xlu0 %1030 }
 0x6b0   : > { %v934_v44 = vpop.permute.xlu1 %933 }
 0x6b1   : > { %1739 = vmatmul.msk.f32.vlgmr.msra.gmra.mxu1 %vm563_vm3, %v934_v44 }
 0x6b3   : > { %v528_v51 = vpop.f32.mrf.mxu0 }
 0x6b4   : > { %v529_v52 = vadd.f32 %v2121_v37, %v528_v51 }
 0x6b8   : > { %v1009_v48 = vpop.permute.xlu1 %1008 }
 0x6b9   : > { %1740 = vmatmul.msk.f32.gmra.mxu1 %vm563_vm3, %v936_v19 }
 0x6c0   : > { %v1033_v29 = vpop.permute.xlu1 %1032 }
 0x72e   : > { %v958_v46 = vpop.f32.mrf.mxu1 }
 0x72f   : > { %v964_v47 = vadd.f32 %v958_v46, %v526_v45 }
 0x731   : > { %v1741_v49 = vmul.f32 -1.442695, %v964_v47  ;;  %v1014_v50 = vadd.f32 %v1009_v48, %v964_v47 }
 0x733   : > { %1856 = vpow2.f32 %v1741_v49 }
 0x734   : > { %1858 = vtanh.f32 %v1014_v50 }
 0x736   : > { %v961_v53 = vpop.f32.mrf.mxu1 }
 0x737   : > { %v965_v54 = vadd.f32 %v961_v53, %v529_v52  ;;  %v532_v52 = vadd.f32 %v2121_v37, %v2112_v33 }
 0x739   : > { %v1857_v56 = vpop.eup %1856  ;;  %v1742_v57 = vmul.f32 -1.442695, %v965_v54  ;;  %v1015_v61 = vadd.f32 %v1011_v55, %v965_v54 }
 0x73a   : > { %v1859_v62 = vpop.eup %1858  ;;  %v972_v63 = vadd.f32 1.0, %v1857_v56 }
 0x73b   : > { %1860 = vpow2.f32 %v1742_v57  ;;  %1020 = vrot.lane.b32.xlu2 %v1859_v62, %s1949_s26 }
 0x73c   : > { %1862 = vrcp.f32 %v972_v63  ;;  %v985_v14 = vand.u32 2147483648, %v972_v63  ;;  %v983_v16 = vand.u32 2147483647, %v972_v63  ;;  %vm979_vm14 = vweird.f32 %v972_v63 }
 0x73d   : > { %1864 = vtanh.f32 %v1015_v61 }
 0x73e   : > { %v986_v17 = vor.u32 1.1754944e-38, %v985_v14  ;;  %vm984_vm1 = vcmp.eq.f32.partialorder %v983_v16, 8.507059e+37 }
 0x741   : > { %v1861_v0 = vpop.eup %1860 }
 0x742   : > { %v1863_v1 = vpop.eup %1862  ;;  %v973_v2 = vadd.f32 1.0, %v1861_v0 }
 0x743   : > { %v1865_v3 = vpop.eup %1864  ;;  %v975_v4 = vmul.f32 %v1863_v1, %v972_v63  ;;  %vm980_vm13 = vweird.f32 %v1863_v1  ;;  %v535_v63 = vadd.f32 %v2121_v37, %v2114_v34 }
 0x744   : > { %1866 = vrcp.f32 %v973_v2  ;;  %1022 = vrot.lane.b32.xlu1 %v1865_v3, %s1949_s26  ;;  %vm981_vm15 = vmor %vm979_vm14, %vm980_vm13  ;;  %v1000_v18 = vand.u32 2147483648, %v973_v2  ;;  %v998_v21 = vand.u32 2147483647, %v973_v2  ;;  %vm994_vm4 = vweird.f32 %v973_v2 }
 0x745   : > { %v976_v5 = vsub.f32 1.0, %v975_v4 }
 0x746   : > { %v1001_v27 = vor.u32 1.1754944e-38, %v1000_v18  ;;  %vm999_vm6 = vcmp.eq.f32.partialorder %v998_v21, 8.507059e+37 }
 0x747   : > { %v977_v15 = vmul.f32 %v1863_v1, %v976_v5 }
 0x749   : > { %v978_v6 = vadd.f32 %v1863_v1, %v977_v15 }
 0x74a   : > { %v1867_v7 = vpop.eup %1866 }
 0x74b   : > { %v990_v8 = vmul.f32 %v1867_v7, %v973_v2  ;;  %v982_v9 = vsel %vm981_vm15, %v1863_v1, %v978_v6  ;;  %vm995_vm2 = vweird.f32 %v1867_v7 }
 0x74c   : > { %v987_v11 = vsel %vm984_vm1, %v986_v17, %v982_v9  ;;  %vm996_vm5 = vmor %vm994_vm4, %vm995_vm2 }
 0x74d   : > { %v1036_v12 = vmul.f32 %v1031_v10, %v987_v11  ;;  %v991_v13 = vsub.f32 1.0, %v990_v8 }
 0x74f   : > { %1040 = vrot.lane.b32.xlu0 %v1036_v12, %s1950_s27  ;;  %v992_v20 = vmul.f32 %v1867_v7, %v991_v13 }
 0x751   : > { %v993_v26 = vadd.f32 %v1867_v7, %v992_v20 }
 0x753   : > { %v997_v28 = vsel %vm996_vm5, %v1867_v7, %v993_v26 }
 0x754   : > { %v1002_v30 = vsel %vm999_vm6, %v1001_v27, %v997_v28 }
 0x755   : > { %v1037_v31 = vmul.f32 %v1033_v29, %v1002_v30 }
 0x757   : > { %1042 = vrot.lane.b32.xlu2 %v1037_v31, %s1950_s27 }
 0x795   : > { %v1021_v32 = vpop.permute.xlu2 %1020 }
 0x796   : > { %v1026_v41 = vmul.f32 %v1021_v32, %v987_v11 }
 0x7b1   : > { %v1043_v39 = vpop.permute.xlu2 %1042 }
 0x7b6   : > { %v1023_v36 = vpop.permute.xlu1 %1022 }
 0x7b7   : > { %v1027_v38 = vmul.f32 %v1023_v36, %v1002_v30 }
 0x7b9   : > { %v1047_v40 = vadd.f32 %v1043_v39, %v1027_v38 }
 0x7bb   : > { %1868 = vtanh.f32 %v1047_v40  ;;  %v1134_v49 = vmul.f32 %v2086_v24, %v1047_v40 }
 0x7c1   : > { %v1869_v42 = vpop.eup %1868  ;;  %v1041_v43 = vpop.permute.xlu0 %1040 }
 0x7c2   : > { %1054 = vrot.lane.b32.xlu1 %v1869_v42, %s1949_s26  ;;  %v1046_v44 = vadd.f32 %v1041_v43, %v1026_v41 }
 0x7c4   : > { %1870 = vtanh.f32 %v1046_v44  ;;  %v1133_v19 = vmul.f32 %v2086_v24, %v1046_v44 }
 0x7ca   : > { %v1871_v22 = vpop.eup %1870  ;;  %1137 = vrot.lane.b32.xlu1 %v1133_v19, %s1948_s23 }
 0x7cb   : > { %1052 = vrot.lane.b32.xlu0 %v1871_v22, %s1949_s26 }
 0x7d2   : > { %1161 = vrot.lane.b32.xlu1 %v1047_v40, %s1950_s27 }
 0x834   : > { %v1055_v45 = vpop.permute.xlu1 %1054 }
 0x835   : > { %v1059_v46 = vmul.f32 %v1055_v45, %v1002_v30 }
 0x837   : > { %1064 = vrot.lane.b32.xlu0 %v1059_v46, %s1948_s23  ;;  %v2274_v46 = vld [vmem:[%s2403_s4] ss:$0 sm:$0xff] }
 0x83c   : > { %v1138_v55 = vpop.permute.xlu1 %1137 }
 0x83d   : > { %v1053_v47 = vpop.permute.xlu0 %1052 }
 0x83e   : > { %v1058_v48 = vmul.f32 %v1053_v47, %v987_v11 }
 0x83f   : > { %1159 = vrot.lane.b32.xlu0 %v1046_v44, %s1950_s27 }
 0x840   : > { %1062 = vrot.lane.b32.xlu2 %v1058_v48, %s1948_s23 }
 0x844   : > { %v1162_v31 = vpop.permute.xlu1 %1161 }
 0x848   : > { %1139 = vrot.lane.b32.xlu2 %v1134_v49, %s1948_s23 }
 0x89a   : > { %v1063_v50 = vpop.permute.xlu2 %1062 }
 0x89b   : > { %1743 = vmatmul.msk.f32.vlgmr.msra.gmra.mxu2 %vm563_vm3, %v1063_v50 }
 0x8a2   : > { %v1140_v2 = vpop.permute.xlu2 %1139 }
 0x8a9   : > { %v1065_v51 = vpop.permute.xlu0 %1064 }
 0x8aa   : > { %1744 = vmatmul.msk.f32.gmra.mxu2 %vm563_vm3, %v1065_v51 }
 0x8b1   : > { %v1160_v10 = vpop.permute.xlu0 %1159 }
 0x91e   : > { %v1087_v53 = vpop.f32.mrf.mxu2 }
 0x91f   : > { %v1093_v54 = vadd.f32 %v1087_v53, %v532_v52 }
 0x921   : > { %v1745_v56 = vmul.f32 -1.442695, %v1093_v54  ;;  %v1143_v57 = vadd.f32 %v1138_v55, %v1093_v54  ;;  %v2289_v55 = vld [vmem:[%s2401_s2] ss:$0 sm:$0xff] }
 0x923   : > { %1872 = vpow2.f32 %v1745_v56  ;;  %v538_v56 = vadd.f32 %v2289_v55, %v2116_v35 }
 0x924   : > { %1874 = vtanh.f32 %v1143_v57 }
 0x929   : > { %v1873_v61 = vpop.eup %1872 }
 0x92a   : > { %v1875_v24 = vpop.eup %1874  ;;  %v1101_v62 = vadd.f32 1.0, %v1873_v61 }
 0x92b   : > { %1149 = vrot.lane.b32.xlu2 %v1875_v24, %s1949_s26 }
 0x92c   : > { %1876 = vrcp.f32 %v1101_v62  ;;  %v1114_v15 = vand.u32 2147483648, %v1101_v62  ;;  %v1112_v6 = vand.u32 2147483647, %v1101_v62  ;;  %vm1108_vm8 = vweird.f32 %v1101_v62 }
 0x92d   : > { %v1090_v0 = vpop.f32.mrf.mxu2 }
 0x92e   : > { %v1094_v1 = vadd.f32 %v1090_v0, %v535_v63  ;;  %v1115_v34 = vor.u32 1.1754944e-38, %v1114_v15  ;;  %vm1113_vm10 = vcmp.eq.f32.partialorder %v1112_v6, 8.507059e+37 }
 0x930   : > { %v1746_v33 = vmul.f32 -1.442695, %v1094_v1  ;;  %v1144_v3 = vadd.f32 %v1140_v2, %v1094_v1 }
 0x932   : > { %v1877_v4 = vpop.eup %1876  ;;  %1878 = vpow2.f32 %v1746_v33 }
 0x933   : > { %v1104_v5 = vmul.f32 %v1877_v4, %v1101_v62  ;;  %1880 = vtanh.f32 %v1144_v3  ;;  %vm1109_vm7 = vweird.f32 %v1877_v4  ;;  %v541_v3 = vadd.f32 %v2289_v55, %v2169_v58 }
 0x934   : > { %vm1110_vm9 = vmor %vm1108_vm8, %vm1109_vm7 }
 0x935   : > { %v1105_v14 = vsub.f32 1.0, %v1104_v5 }
 0x937   : > { %v1106_v16 = vmul.f32 %v1877_v4, %v1105_v14 }
 0x938   : > { %v1879_v7 = vpop.eup %1878 }
 0x939   : > { %v1881_v17 = vpop.eup %1880  ;;  %v1102_v8 = vadd.f32 1.0, %v1879_v7  ;;  %v1107_v9 = vadd.f32 %v1877_v4, %v1106_v16 }
 0x93a   : > { %1151 = vrot.lane.b32.xlu1 %v1881_v17, %s1949_s26 }
 0x93b   : > { %1882 = vrcp.f32 %v1102_v8  ;;  %v1111_v37 = vsel %vm1110_vm9, %v1877_v4, %v1107_v9  ;;  %v1129_v21 = vand.u32 2147483648, %v1102_v8  ;;  %v1127_v27 = vand.u32 2147483647, %v1102_v8 }
 0x93c   : > { %v1116_v11 = vsel %vm1113_vm10, %v1115_v34, %v1111_v37  ;;  %vm1123_vm12 = vweird.f32 %v1102_v8 }
 0x93d   : > { %v1165_v12 = vmul.f32 %v1160_v10, %v1116_v11  ;;  %v1130_v29 = vor.u32 1.1754944e-38, %v1129_v21  ;;  %vm1128_vm14 = vcmp.eq.f32.partialorder %v1127_v27, 8.507059e+37 }
 0x93f   : > { %1169 = vrot.lane.b32.xlu0 %v1165_v12, %s1950_s27 }
 0x941   : > { %v1883_v13 = vpop.eup %1882 }
 0x942   : > { %v1119_v18 = vmul.f32 %v1883_v13, %v1102_v8  ;;  %vm1124_vm11 = vweird.f32 %v1883_v13 }
 0x943   : > { %vm1125_vm13 = vmor %vm1123_vm12, %vm1124_vm11 }
 0x944   : > { %v1120_v20 = vsub.f32 1.0, %v1119_v18 }
 0x946   : > { %v1121_v26 = vmul.f32 %v1883_v13, %v1120_v20 }
 0x948   : > { %v1122_v28 = vadd.f32 %v1883_v13, %v1121_v26 }
 0x94a   : > { %v1126_v30 = vsel %vm1125_vm13, %v1883_v13, %v1122_v28 }
 0x94b   : > { %v1131_v32 = vsel %vm1128_vm14, %v1130_v29, %v1126_v30 }
 0x94c   : > { %v1166_v36 = vmul.f32 %v1162_v31, %v1131_v32 }
 0x94e   : > { %1171 = vrot.lane.b32.xlu2 %v1166_v36, %s1950_s27 }
 0x985   : > { %v1150_v38 = vpop.permute.xlu2 %1149 }
 0x986   : > { %v1155_v43 = vmul.f32 %v1150_v38, %v1116_v11 }
 0x9a8   : > { %v1172_v41 = vpop.permute.xlu2 %1171 }
 0x9ac   : > { %v1152_v39 = vpop.permute.xlu1 %1151 }
 0x9ad   : > { %v1156_v40 = vmul.f32 %v1152_v39, %v1131_v32 }
 0x9af   : > { %v1176_v42 = vadd.f32 %v1172_v41, %v1156_v40 }
 0x9b1   : > { %1884 = vtanh.f32 %v1176_v42  ;;  %v1170_v44 = vpop.permute.xlu0 %1169  ;;  %v1263_v52 = vmul.f32 %v2274_v46, %v1176_v42 }
 0x9b2   : > { %v1175_v19 = vadd.f32 %v1170_v44, %v1155_v43 }
 0x9b4   : > { %1886 = vtanh.f32 %v1175_v19  ;;  %v1262_v47 = vmul.f32 %v2274_v46, %v1175_v19 }
 0x9b7   : > { %v1885_v22 = vpop.eup %1884 }
 0x9b8   : > { %1183 = vrot.lane.b32.xlu1 %v1885_v22, %s1949_s26 }
 0x9ba   : > { %v1887_v45 = vpop.eup %1886 }
 0x9bb   : > { %1181 = vrot.lane.b32.xlu0 %v1887_v45, %s1949_s26 }
 0x9c0   : > { %1266 = vrot.lane.b32.xlu1 %v1262_v47, %s1948_s23 }
 0x9c8   : > { %1290 = vrot.lane.b32.xlu1 %v1176_v42, %s1950_s27 }
 0xa2a   : > { %v1184_v48 = vpop.permute.xlu1 %1183 }
 0xa2b   : > { %v1188_v49 = vmul.f32 %v1184_v48, %v1131_v32 }
 0xa2d   : > { %1193 = vrot.lane.b32.xlu0 %v1188_v49, %s1948_s23  ;;  %v1182_v50 = vpop.permute.xlu0 %1181 }
 0xa2e   : > { %v1187_v51 = vmul.f32 %v1182_v50, %v1116_v11 }
 0xa30   : > { %1191 = vrot.lane.b32.xlu2 %v1187_v51, %s1948_s23 }
 0xa32   : > { %v1267_v24 = vpop.permute.xlu1 %1266 }
 0xa35   : > { %1288 = vrot.lane.b32.xlu0 %v1175_v19, %s1950_s27 }
 0xa38   : > { %1268 = vrot.lane.b32.xlu2 %v1263_v52, %s1948_s23 }
 0xa3a   : > { %v1291_v36 = vpop.permute.xlu1 %1290 }
 0xa8a   : > { %v1192_v53 = vpop.permute.xlu2 %1191 }
 0xa8b   : > { %1747 = vmatmul.msk.f32.vlgmr.msra.gmra.mxu3 %vm563_vm3, %v1192_v53 }
 0xa92   : > { %v1269_v14 = vpop.permute.xlu2 %1268 }
 0xa9f   : > { %v1194_v54 = vpop.permute.xlu0 %1193 }
 0xaa0   : > { %1748 = vmatmul.msk.f32.gmra.mxu3 %vm563_vm3, %v1194_v54 }
 0xaa7   : > { %v1289_v58 = vpop.permute.xlu0 %1288 }
 0xb0e   : > { %v1216_v57 = vpop.f32.mrf.mxu3 }
 0xb0f   : > { %v1222_v61 = vadd.f32 %v1216_v57, %v538_v56 }
 0xb11   : > { %v1749_v62 = vmul.f32 -1.442695, %v1222_v61  ;;  %v1272_v63 = vadd.f32 %v1267_v24, %v1222_v61  ;;  %v544_v61 = vadd.f32 %v2289_v55, %v2171_v59 }
 0xb13   : > { %1888 = vpow2.f32 %v1749_v62 }
 0xb14   : > { %1890 = vtanh.f32 %v1272_v63 }
 0xb19   : > { %v1889_v0 = vpop.eup %1888 }
 0xb1a   : > { %v1891_v1 = vpop.eup %1890  ;;  %v1230_v2 = vadd.f32 1.0, %v1889_v0 }
 0xb1b   : > { %1278 = vrot.lane.b32.xlu2 %v1891_v1, %s1949_s26 }
 0xb1c   : > { %1892 = vrcp.f32 %v1230_v2  ;;  %v1243_v7 = vand.u32 2147483648, %v1230_v2  ;;  %v1241_v8 = vand.u32 2147483647, %v1230_v2  ;;  %vm1237_vm1 = vweird.f32 %v1230_v2 }
 0xb1e   : > { %v1244_v34 = vor.u32 1.1754944e-38, %v1243_v7  ;;  %vm1242_vm4 = vcmp.eq.f32.partialorder %v1241_v8, 8.507059e+37 }
 0xb22   : > { %v1893_v33 = vpop.eup %1892 }
 0xb23   : > { %v1233_v4 = vmul.f32 %v1893_v33, %v1230_v2  ;;  %v1219_v5 = vpop.f32.mrf.mxu3  ;;  %vm1238_vm15 = vweird.f32 %v1893_v33 }
 0xb24   : > { %v1223_v35 = vadd.f32 %v1219_v5, %v541_v3  ;;  %vm1239_vm2 = vmor %vm1237_vm1, %vm1238_vm15 }
 0xb25   : > { %v1234_v15 = vsub.f32 1.0, %v1233_v4 }
 0xb26   : > { %v1750_v16 = vmul.f32 -1.442695, %v1223_v35  ;;  %v1273_v6 = vadd.f32 %v1269_v14, %v1223_v35 }
 0xb27   : > { %v1235_v17 = vmul.f32 %v1893_v33, %v1234_v15 }
 0xb28   : > { %1894 = vpow2.f32 %v1750_v16  ;;  %v547_v16 = vadd.f32 %v2289_v55, %v2173_v60 }
 0xb29   : > { %1896 = vtanh.f32 %v1273_v6  ;;  %v1236_v9 = vadd.f32 %v1893_v33, %v1235_v17 }
 0xb2b   : > { %v1240_v37 = vsel %vm1239_vm2, %v1893_v33, %v1236_v9 }
 0xb2c   : > { %v1245_v10 = vsel %vm1242_vm4, %v1244_v34, %v1240_v37 }
 0xb2d   : > { %v1294_v11 = vmul.f32 %v1289_v58, %v1245_v10 }
 0xb2e   : > { %v1895_v12 = vpop.eup %1894 }
 0xb2f   : > { %v1897_v13 = vpop.eup %1896  ;;  %v1231_v18 = vadd.f32 1.0, %v1895_v12  ;;  %1298 = vrot.lane.b32.xlu0 %v1294_v11, %s1950_s27 }
 0xb30   : > { %1280 = vrot.lane.b32.xlu1 %v1897_v13, %s1949_s26 }
 0xb31   : > { %1898 = vrcp.f32 %v1231_v18  ;;  %v1258_v27 = vand.u32 2147483648, %v1231_v18  ;;  %v1256_v29 = vand.u32 2147483647, %v1231_v18  ;;  %vm1252_vm6 = vweird.f32 %v1231_v18 }
 0xb33   : > { %v1259_v31 = vor.u32 1.1754944e-38, %v1258_v27  ;;  %vm1257_vm8 = vcmp.eq.f32.partialorder %v1256_v29, 8.507059e+37 }
 0xb37   : > { %v1899_v20 = vpop.eup %1898 }
 0xb38   : > { %v1248_v21 = vmul.f32 %v1899_v20, %v1231_v18  ;;  %vm1253_vm5 = vweird.f32 %v1899_v20 }
 0xb39   : > { %vm1254_vm7 = vmor %vm1252_vm6, %vm1253_vm5 }
 0xb3a   : > { %v1249_v26 = vsub.f32 1.0, %v1248_v21 }
 0xb3c   : > { %v1250_v28 = vmul.f32 %v1899_v20, %v1249_v26 }
 0xb3e   : > { %v1251_v30 = vadd.f32 %v1899_v20, %v1250_v28 }
 0xb40   : > { %v1255_v32 = vsel %vm1254_vm7, %v1899_v20, %v1251_v30 }
 0xb41   : > { %v1260_v38 = vsel %vm1257_vm8, %v1259_v31, %v1255_v32 }
 0xb42   : > { %v1295_v39 = vmul.f32 %v1291_v36, %v1260_v38 }
 0xb44   : > { %1300 = vrot.lane.b32.xlu2 %v1295_v39, %s1950_s27 }
 0xb75   : > { %v1279_v40 = vpop.permute.xlu2 %1278 }
 0xb76   : > { %v1284_v41 = vmul.f32 %v1279_v40, %v1245_v10 }
 0xb9e   : > { %v1301_v22 = vpop.permute.xlu2 %1300 }
 0xba1   : > { %v1299_v42 = vpop.permute.xlu0 %1298 }
 0xba2   : > { %v1281_v43 = vpop.permute.xlu1 %1280  ;;  %v1304_v44 = vadd.f32 %v1299_v42, %v1284_v41 }
 0xba3   : > { %v1285_v19 = vmul.f32 %v1281_v43, %v1260_v38 }
 0xba4   : > { %1900 = vtanh.f32 %v1304_v44  ;;  %v1391_v49 = vmul.f32 %v2274_v46, %v1304_v44 }
 0xba5   : > { %v1305_v45 = vadd.f32 %v1301_v22, %v1285_v19 }
 0xba7   : > { %1902 = vtanh.f32 %v1305_v45  ;;  %v1392_v54 = vmul.f32 %v2274_v46, %v1305_v45 }
 0xbaa   : > { %v1901_v47 = vpop.eup %1900 }
 0xbab   : > { %1310 = vrot.lane.b32.xlu0 %v1901_v47, %s1949_s26 }
 0xbad   : > { %v1903_v48 = vpop.eup %1902 }
 0xbae   : > { %1312 = vrot.lane.b32.xlu1 %v1903_v48, %s1949_s26 }
 0xbb6   : > { %1395 = vrot.lane.b32.xlu1 %v1391_v49, %s1948_s23 }
 0xbbe   : > { %1419 = vrot.lane.b32.xlu1 %v1305_v45, %s1950_s27 }
 0xc1d   : > { %v1311_v50 = vpop.permute.xlu0 %1310 }
 0xc1e   : > { %v1316_v51 = vmul.f32 %v1311_v50, %v1245_v10 }
 0xc20   : > { %v1313_v52 = vpop.permute.xlu1 %1312  ;;  %1320 = vrot.lane.b32.xlu2 %v1316_v51, %s1948_s23 }
 0xc21   : > { %v1317_v53 = vmul.f32 %v1313_v52, %v1260_v38 }
 0xc23   : > { %1322 = vrot.lane.b32.xlu0 %v1317_v53, %s1948_s23 }
 0xc28   : > { %1397 = vrot.lane.b32.xlu2 %v1392_v54, %s1948_s23  ;;  %v1396_v63 = vpop.permute.xlu1 %1395 }
 0xc2b   : > { %1417 = vrot.lane.b32.xlu0 %v1304_v44, %s1950_s27 }
 0xc30   : > { %v1420_v36 = vpop.permute.xlu1 %1419 }
 0xc7a   : > { %v1321_v56 = vpop.permute.xlu2 %1320 }
 0xc7b   : > { %1751 = vmatmul.msk.f32.vlgmr.msrb.gmra.mxu1 %vm563_vm3, %v1321_v56 }
 0xc82   : > { %v1398_v9 = vpop.permute.xlu2 %1397 }
 0xc95   : > { %v1323_v57 = vpop.permute.xlu0 %1322 }
 0xc96   : > { %1752 = vmatmul.msk.f32.gmra.mxu1 %vm563_vm3, %v1323_v57 }
 0xc9d   : > { %v1418_v37 = vpop.permute.xlu0 %1417 }
 0xcf8   : > { %v1345_v24 = vpop.f32.mrf.mxu1 }
 0xcf9   : > { %v1351_v62 = vadd.f32 %v1345_v24, %v544_v61  ;;  %v550_v61 = vadd.f32 %v2289_v55, %v2213_v23 }
 0xcfb   : > { %v1753_v0 = vmul.f32 -1.442695, %v1351_v62  ;;  %v1401_v1 = vadd.f32 %v1396_v63, %v1351_v62 }
 0xcfd   : > { %1904 = vpow2.f32 %v1753_v0 }
 0xcfe   : > { %1906 = vtanh.f32 %v1401_v1 }
 0xd03   : > { %v1905_v2 = vpop.eup %1904 }
 0xd04   : > { %v1907_v33 = vpop.eup %1906  ;;  %v1359_v3 = vadd.f32 1.0, %v1905_v2 }
 0xd05   : > { %1407 = vrot.lane.b32.xlu2 %v1907_v33, %s1949_s26 }
 0xd06   : > { %1908 = vrcp.f32 %v1359_v3  ;;  %v1372_v14 = vand.u32 2147483648, %v1359_v3  ;;  %v1370_v59 = vand.u32 2147483647, %v1359_v3  ;;  %vm1366_vm10 = vweird.f32 %v1359_v3 }
 0xd08   : > { %v1373_v8 = vor.u32 1.1754944e-38, %v1372_v14  ;;  %vm1371_vm12 = vcmp.eq.f32.partialorder %v1370_v59, 8.507059e+37 }
 0xd0c   : > { %v1909_v4 = vpop.eup %1908 }
 0xd0d   : > { %v1362_v5 = vmul.f32 %v1909_v4, %v1359_v3  ;;  %vm1367_vm9 = vweird.f32 %v1909_v4 }
 0xd0e   : > { %vm1368_vm11 = vmor %vm1366_vm10, %vm1367_vm9 }
 0xd0f   : > { %v1363_v35 = vsub.f32 1.0, %v1362_v5 }
 0xd11   : > { %v1364_v15 = vmul.f32 %v1909_v4, %v1363_v35 }
 0xd13   : > { %v1348_v6 = vpop.f32.mrf.mxu1  ;;  %v1365_v7 = vadd.f32 %v1909_v4, %v1364_v15 }
 0xd14   : > { %v1352_v17 = vadd.f32 %v1348_v6, %v547_v16 }
 0xd15   : > { %v1369_v34 = vsel %vm1368_vm11, %v1909_v4, %v1365_v7 }
 0xd16   : > { %v1754_v58 = vmul.f32 -1.442695, %v1352_v17  ;;  %v1402_v10 = vadd.f32 %v1398_v9, %v1352_v17  ;;  %v1374_v11 = vsel %vm1371_vm12, %v1373_v8, %v1369_v34  ;;  %v553_v8 = vadd.f32 %v2289_v55, %v2215_v25 }
 0xd17   : > { %v1423_v12 = vmul.f32 %v1418_v37, %v1374_v11 }
 0xd18   : > { %1910 = vpow2.f32 %v1754_v58 }
 0xd19   : > { %1912 = vtanh.f32 %v1402_v10  ;;  %1427 = vrot.lane.b32.xlu0 %v1423_v12, %s1950_s27 }
 0xd1e   : > { %v1911_v13 = vpop.eup %1910 }
 0xd1f   : > { %v1913_v60 = vpop.eup %1912  ;;  %v1360_v18 = vadd.f32 1.0, %v1911_v13 }
 0xd20   : > { %1409 = vrot.lane.b32.xlu1 %v1913_v60, %s1949_s26 }
 0xd21   : > { %1914 = vrcp.f32 %v1360_v18  ;;  %v1387_v27 = vand.u32 2147483648, %v1360_v18  ;;  %v1385_v29 = vand.u32 2147483647, %v1360_v18  ;;  %vm1381_vm14 = vweird.f32 %v1360_v18 }
 0xd23   : > { %v1388_v31 = vor.u32 1.1754944e-38, %v1387_v27  ;;  %vm1386_vm1 = vcmp.eq.f32.partialorder %v1385_v29, 8.507059e+37 }
 0xd27   : > { %v1915_v20 = vpop.eup %1914 }
 0xd28   : > { %v1377_v21 = vmul.f32 %v1915_v20, %v1360_v18  ;;  %vm1382_vm13 = vweird.f32 %v1915_v20 }
 0xd29   : > { %vm1383_vm15 = vmor %vm1381_vm14, %vm1382_vm13 }
 0xd2a   : > { %v1378_v26 = vsub.f32 1.0, %v1377_v21 }
 0xd2c   : > { %v1379_v28 = vmul.f32 %v1915_v20, %v1378_v26 }
 0xd2e   : > { %v1380_v30 = vadd.f32 %v1915_v20, %v1379_v28 }
 0xd30   : > { %v1384_v32 = vsel %vm1383_vm15, %v1915_v20, %v1380_v30 }
 0xd31   : > { %v1389_v38 = vsel %vm1386_vm1, %v1388_v31, %v1384_v32 }
 0xd32   : > { %v1424_v39 = vmul.f32 %v1420_v36, %v1389_v38 }
 0xd34   : > { %1429 = vrot.lane.b32.xlu2 %v1424_v39, %s1950_s27 }
 0xd5f   : > { %v1408_v40 = vpop.permute.xlu2 %1407 }
 0xd60   : > { %v1413_v41 = vmul.f32 %v1408_v40, %v1374_v11 }
 0xd8b   : > { %v1428_v42 = vpop.permute.xlu0 %1427 }
 0xd8c   : > { %v1433_v43 = vadd.f32 %v1428_v42, %v1413_v41 }
 0xd8e   : > { %1916 = vtanh.f32 %v1433_v43  ;;  %v1430_v45 = vpop.permute.xlu2 %1429  ;;  %v1520_v49 = vmul.f32 %v2274_v46, %v1433_v43 }
 0xd92   : > { %v1410_v44 = vpop.permute.xlu1 %1409 }
 0xd93   : > { %v1414_v19 = vmul.f32 %v1410_v44, %v1389_v38 }
 0xd94   : > { %v1917_v22 = vpop.eup %1916 }
 0xd95   : > { %v1434_v47 = vadd.f32 %v1430_v45, %v1414_v19  ;;  %1439 = vrot.lane.b32.xlu0 %v1917_v22, %s1949_s26  ;;  %v1591_v22 = vld [vmem:[%s2404_s5 + $0x38] sm:$0xff]  ;;  %v1590_v45 = vld [vmem:[%s2404_s5 + $0x30] sm:$0xff] }
 0xd96   : > { %1607 = vmatpush.msrb.mxu3 %v1591_v22 }
 0xd97   : > { %1918 = vtanh.f32 %v1434_v47  ;;  %v1521_v53 = vmul.f32 %v2274_v46, %v1434_v47 }
 0xd98   : > { %1608 = vmatpush.msrb.mxu3 %v1590_v45 }
 0xd9d   : > { %v1919_v48 = vpop.eup %1918 }
 0xd9e   : > { %1441 = vrot.lane.b32.xlu1 %v1919_v48, %s1949_s26  ;;  %v1588_v48 = vld [vmem:[%s2404_s5 + $0x20] sm:$0xff] }
 0xda6   : > { %1524 = vrot.lane.b32.xlu1 %v1520_v49, %s1948_s23  ;;  %v1587_v49 = vld [vmem:[%s2404_s5 + $0x18] sm:$0xff] }
 0xdae   : > { %1548 = vrot.lane.b32.xlu1 %v1434_v47, %s1950_s27  ;;  %v1589_v47 = vld [vmem:[%s2404_s5 + $0x28] sm:$0xff] }
 0xdaf   : > { %1609 = vmatpush.msrb.mxu3 %v1589_v47 }
 0xdb1   : > { %1610 = vmatpush.msrb.mxu3 %v1588_v48 }
 0xdb3   : > { %1611 = vmatpush.msrb.mxu3 %v1587_v49 }
 0xe07   : > { %v1440_v50 = vpop.permute.xlu0 %1439 }
 0xe08   : > { %v1445_v51 = vmul.f32 %v1440_v50, %v1374_v11  ;;  %v1586_v50 = vld [vmem:[%s2404_s5 + $0x10] sm:$0xff] }
 0xe09   : > { %1612 = vmatpush.msrb.mxu3 %v1586_v50 }
 0xe0a   : > { %1449 = vrot.lane.b32.xlu2 %v1445_v51, %s1948_s23  ;;  %v1585_v51 = vld [vmem:[%s2404_s5 + $0x8] sm:$0xff] }
 0xe0b   : > { %1613 = vmatpush.msrb.mxu3 %v1585_v51 }
 0xe10   : > { %v1442_v52 = vpop.permute.xlu1 %1441 }
 0xe11   : > { %v1446_v54 = vmul.f32 %v1442_v52, %v1389_v38  ;;  %v1584_v52 = vld [vmem:[%s2404_s5] sm:$0xff] }
 0xe12   : > { %1526 = vrot.lane.b32.xlu2 %v1521_v53, %s1948_s23  ;;  %1614 = vmatpush.msrb.mxu3 %v1584_v52 }
 0xe13   : > { %1451 = vrot.lane.b32.xlu0 %v1446_v54, %s1948_s23 }
 0xe18   : > { %v1525_v63 = vpop.permute.xlu1 %1524 }
 0xe1b   : > { %1546 = vrot.lane.b32.xlu0 %v1433_v43, %s1950_s27 }
 0xe20   : > { %v1549_v29 = vpop.permute.xlu1 %1548 }
 0xe64   : > { %v1450_v56 = vpop.permute.xlu2 %1449 }
 0xe65   : > { %1755 = vmatmul.msk.f32.vlgmr.msrb.gmra.mxu2 %vm563_vm3, %v1450_v56 }
 0xe6c   : > { %v1527_v37 = vpop.permute.xlu2 %1526 }
 0xe85   : > { %v1452_v57 = vpop.permute.xlu0 %1451 }
 0xe86   : > { %1756 = vmatmul.msk.f32.gmra.mxu2 %vm563_vm3, %v1452_v57 }
 0xe8d   : > { %v1547_v6 = vpop.permute.xlu0 %1546 }
 0xee8   : > { %v1474_v24 = vpop.f32.mrf.mxu2 }
 0xee9   : > { %v1480_v62 = vadd.f32 %v1474_v24, %v550_v61 }
 0xeeb   : > { %v1757_v46 = vmul.f32 -1.442695, %v1480_v62  ;;  %v1530_v0 = vadd.f32 %v1525_v63, %v1480_v62  ;;  %v1623_v62 = vld [vmem:[%s2406_s7 + $0x18] sm:$0xff]  ;;  %v1622_v63 = vld [vmem:[%s2406_s7 + $0x10] sm:$0xff] }
 0xeec   : > { %1643 = vmatpush.msra.mxu3 %v1623_v62 }
 0xeed   : > { %1920 = vpow2.f32 %v1757_v46 }
 0xeee   : > { %1922 = vtanh.f32 %v1530_v0  ;;  %1644 = vmatpush.msra.mxu3 %v1622_v63 }
 0xef3   : > { %v1921_v1 = vpop.eup %1920 }
 0xef4   : > { %v1923_v2 = vpop.eup %1922  ;;  %v1488_v33 = vadd.f32 1.0, %v1921_v1 }
 0xef5   : > { %1536 = vrot.lane.b32.xlu2 %v1923_v2, %s1949_s26  ;;  %v1621_v2 = vld [vmem:[%s2406_s7 + $0x8] sm:$0xff] }
 0xef6   : > { %1924 = vrcp.f32 %v1488_v33  ;;  %v1501_v35 = vand.u32 2147483648, %v1488_v33  ;;  %v1499_v23 = vand.u32 2147483647, %v1488_v33  ;;  %vm1495_vm4 = vweird.f32 %v1488_v33  ;;  %1645 = vmatpush.msra.mxu3 %v1621_v2 }
 0xef8   : > { %v1502_v59 = vor.u32 1.1754944e-38, %v1501_v35  ;;  %vm1500_vm6 = vcmp.eq.f32.partialorder %v1499_v23, 8.507059e+37 }
 0xefc   : > { %v1925_v3 = vpop.eup %1924 }
 0xefd   : > { %v1491_v4 = vmul.f32 %v1925_v3, %v1488_v33  ;;  %vm1496_vm2 = vweird.f32 %v1925_v3  ;;  %v1620_v33 = vld [vmem:[%s2406_s7] sm:$0xff] }
 0xefe   : > { %vm1497_vm5 = vmor %vm1495_vm4, %vm1496_vm2  ;;  %1646 = vmatpush.msra.mxu3 %v1620_v33 }
 0xeff   : > { %v1492_v5 = vsub.f32 1.0, %v1491_v4 }
 0xf01   : > { %v1493_v14 = vmul.f32 %v1925_v3, %v1492_v5 }
 0xf03   : > { %v1494_v15 = vadd.f32 %v1925_v3, %v1493_v14  ;;  %v1807_v14 = vld [vmem:[%s2407_s8] ss:$0 sm:$0xff] }
 0xf05   : > { %v1498_v16 = vsel %vm1497_vm5, %v1925_v3, %v1494_v15  ;;  %v1806_v3 = vld [vmem:[%s2405_s6] ss:$0 sm:$0xff] }
 0xf06   : > { %v2334_v7 = vsel %vm1500_vm6, %v1502_v59, %v1498_v16 }
 0xf07   : > { %v1552_v17 = vmul.f32 %v1547_v6, %v2334_v7 }
 0xf09   : > { %v1477_v9 = vpop.f32.mrf.mxu2  ;;  %1556 = vrot.lane.b32.xlu1 %v1552_v17, %s1950_s27 }
 0xf0a   : > { %v1481_v34 = vadd.f32 %v1477_v9, %v553_v8 }
 0xf0c   : > { %v1758_v58 = vmul.f32 -1.442695, %v1481_v34  ;;  %v1531_v10 = vadd.f32 %v1527_v37, %v1481_v34 }
 0xf0e   : > { %1926 = vpow2.f32 %v1758_v58 }
 0xf0f   : > { %1928 = vtanh.f32 %v1531_v10 }
 0xf14   : > { %v1927_v11 = vpop.eup %1926 }
 0xf15   : > { %v1929_v12 = vpop.eup %1928  ;;  %v1489_v13 = vadd.f32 1.0, %v1927_v11 }
 0xf16   : > { %1538 = vrot.lane.b32.xlu0 %v1929_v12, %s1949_s26 }
 0xf17   : > { %1930 = vrcp.f32 %v1489_v13  ;;  %v1516_v21 = vand.u32 2147483648, %v1489_v13  ;;  %v1514_v55 = vand.u32 2147483647, %v1489_v13  ;;  %vm1510_vm8 = vweird.f32 %v1489_v13 }
 0xf19   : > { %v1517_v27 = vor.u32 1.1754944e-38, %v1516_v21  ;;  %vm1515_vm10 = vcmp.eq.f32.partialorder %v1514_v55, 8.507059e+37 }
 0xf1d   : > { %v1931_v60 = vpop.eup %1930 }
 0xf1e   : > { %v1506_v18 = vmul.f32 %v1931_v60, %v1489_v13  ;;  %vm1511_vm7 = vweird.f32 %v1931_v60 }
 0xf1f   : > { %vm1512_vm9 = vmor %vm1510_vm8, %vm1511_vm7 }
 0xf20   : > { %v1507_v20 = vsub.f32 1.0, %v1506_v18 }
 0xf22   : > { %v1508_v25 = vmul.f32 %v1931_v60, %v1507_v20 }
 0xf24   : > { %v1509_v26 = vadd.f32 %v1931_v60, %v1508_v25 }
 0xf26   : > { %v1513_v28 = vsel %vm1512_vm9, %v1931_v60, %v1509_v26 }
 0xf27   : > { %v1518_v30 = vsel %vm1515_vm10, %v1517_v27, %v1513_v28 }
 0xf28   : > { %v1553_v31 = vmul.f32 %v1549_v29, %v1518_v30 }
 0xf2a   : > { %1558 = vrot.lane.b32.xlu2 %v1553_v31, %s1950_s27 }
 0xf4f   : > { %v1537_v32 = vpop.permute.xlu2 %1536 }
 0xf50   : > { %v1542_v36 = vmul.f32 %v1537_v32, %v2334_v7 }
 0xf7b   : > { %v1557_v38 = vpop.permute.xlu1 %1556 }
 0xf7c   : > { %v1562_v39 = vadd.f32 %v1557_v38, %v1542_v36 }
 0xf7e   : > { %1932 = vtanh.f32 %v1562_v39 }
 0xf84   : > { %v1933_v40 = vpop.eup %1932  ;;  %v1559_v43 = vpop.permute.xlu2 %1558 }
 0xf85   : > { %1568 = vrot.lane.b32.xlu0 %v1933_v40, %s1949_s26 }
 0xf88   : > { %v1539_v41 = vpop.permute.xlu0 %1538 }
 0xf89   : > { %v1543_v42 = vmul.f32 %v1539_v41, %v1518_v30 }
 0xf8b   : > { %v1563_v44 = vadd.f32 %v1559_v43, %v1543_v42 }
 0xf8d   : > { %1934 = vtanh.f32 %v1563_v44 }
 0xf93   : > { %v1935_v19 = vpop.eup %1934 }
 0xf94   : > { %1570 = vrot.lane.b32.xlu1 %v1935_v19, %s1949_s26  ;;  %s330_s26 = scalar_lea.vmem %s2408_s9, %s1712_s19 }
 0xff7   : > { %v1569_v53 = vpop.permute.xlu0 %1568 }
 0xff8   : > { %v1574_v56 = vmul.f32 %v1569_v53, %v2334_v7 }
0x1006   : > { %v1571_v54 = vpop.permute.xlu1 %1570 }
0x1007   : > { %v1575_v57 = vmul.f32 %v1571_v54, %v1518_v30 }
0x1009   : > { %v1576_v61 = vmul.f32 %v1575_v57, %v1574_v56  ;;  %v1577_v24 = vsub.f32 %v1574_v56, %v1575_v57 }
0x100b   : > { %1580 = vrot.lane.b32.xlu2 %v1576_v61, %s1948_s23  ;;  %v1578_v46 = vand.u32 2147483647, %v1577_v24 }
0x1065   : > { %v1581_v0 = vpop.permute.xlu2 %1580 }
0x1066   : > { %v1583_v1 = vsel %vm563_vm3, %v1581_v0, %v1578_v46 }
0x1067   : > { %1759 = vmatmul.msk.f32.vlgmr.msrb.gmra.mxu3 %vm441_vm0, %v1583_v1 }
0x10ea   : > { %v1616_v4 = vpop.f32.mrf.mxu3 }
0x10eb   : > { %v1617_v5 = vadd.f32 %v1806_v3, %v1616_v4 }
0x10ed   : > { %v1619_v35 = vmax.f32 %v1617_v5, 0.0 }
0x10ef   : > { %1760 = vmatmul.msk.f32.vlgmr.msra.gmra.mxu3 %vm563_vm3, %v1619_v35 }
0x1172   : > { %v1648_v23 = vpop.f32.mrf.mxu3 }
0x1173   : > { %v1649_v15 = vadd.f32 %v1807_v14, %v1648_v23 }
0x1175   : > { %1651 = vst [vmem:[%s330_s26] sm:$0xff] %v1649_v15 }
0x1176 PF: > { %s19_s30 = sadd.s32 1, %s1944_s30  }
0x1177   : > { %p16_p4 = scmp.ge.s32.totalorder %s19_s30, 4  }
0x1179   :  { %18 = sbr.rel (!%p16_p4) target bundleno = 1 (0x1), region = 86 }

</bundles_post_ra>
